<compile_context>
chip_gen: v7x
topology: tpu7x:2x2x1
jax: 0.10.0
libtpu: 0.0.40
codegen_flags: <defaults>
</compile_context>

<pallas_src>
import jax
import jax.numpy as jnp
from jax.experimental import pallas as pl
from jax.experimental.pallas import tpu as pltpu


# ----------------------------- fused Pallas kernel -----------------------------

def fused_gnn_kernel(h0_ref, a_ref, w_ref, b_ref, mask_ref, gw_ref, gb_ref,
                     cw_ref, cb_ref, out_ref,
                     h_scr, agg_scr, m_scr, l_scr, acc_scr):
    """Grid = (layer l, dst-node block i, src-node block k).

    h_scr   : VMEM (2*n_blk, TN, DP) bf16  — ping/pong node features, resident across layers
    agg_scr : VMEM (TN, DP) f32            — per-(l, i) aggregation accumulator over k
    m/l/acc : online-softmax state for GlobalAttentionPooling (per graph)
    """
    l = pl.program_id(0)
    i = pl.program_id(1)
    k = pl.program_id(2)
    n_l = pl.num_programs(0)
    n_i = pl.num_programs(1)
    n_k = pl.num_programs(2)   # == n_i (square node tiling)

    # Preload initial node features into ping buffer 0 (once, during layer 0 / first dst block).
    @pl.when((l == 0) & (i == 0))
    def _():
        h_scr[k] = h0_ref[...]

    # Zero the aggregation accumulator at the start of each (layer, dst block).
    @pl.when(k == 0)
    def _():
        agg_scr[...] = jnp.zeros_like(agg_scr)

    # agg += A_norm[i, k] @ h_prev[k]    (bf16 MXU inputs, f32 accumulation)
    in_base = (l % 2) * n_k
    h_k = h_scr[in_base + k]                                          # (TN, DP) bf16
    agg_scr[...] += jnp.dot(a_ref[...], h_k, preferred_element_type=jnp.float32)

    @pl.when(k == n_k - 1)
    def _():
        # Feature transform + bias + relu:  h_new = relu(agg @ W_l + b_l)
        z = jnp.dot(agg_scr[...].astype(jnp.bfloat16), w_ref[0],
                    preferred_element_type=jnp.float32) + b_ref[0]    # (TN, DP) f32
        h_new = jnp.maximum(z, 0.0)
        out_base = ((l + 1) % 2) * n_k
        h_scr[out_base + i] = h_new.astype(jnp.bfloat16)

        # After the last layer, fold this dst block into the attention pooling
        # (online softmax across node blocks); classify at the very last block.
        @pl.when(l == n_l - 1)
        def _():
            @pl.when(i == 0)
            def _():
                m_scr[...] = jnp.full_like(m_scr, -1e30)
                l_scr[...] = jnp.zeros_like(l_scr)
                acc_scr[...] = jnp.zeros_like(acc_scr)

            mask = mask_ref[...]                                      # (BP, TN) f32
            # Gate scores via VPU lane reduction (no 1-column MXU matmul).
            gates = jnp.sum(h_new * gw_ref[...], axis=-1, keepdims=True) + gb_ref[...]  # (TN, 1)
            s = jnp.where(mask > 0.0, jnp.transpose(gates), -1e30)    # (BP, TN)

            m_prev = m_scr[...]                                       # (BP, 1)
            m_new = jnp.maximum(m_prev, jnp.max(s, axis=-1, keepdims=True))
            alpha = jnp.exp(m_prev - m_new)
            p = jnp.exp(s - m_new) * mask                             # (BP, TN)
            l_scr[...] = alpha * l_scr[...] + jnp.sum(p, axis=-1, keepdims=True)
            acc_scr[...] = alpha * acc_scr[...] + jnp.dot(
                p, h_new, preferred_element_type=jnp.float32)         # (BP, DP)
            m_scr[...] = m_new

            @pl.when(i == n_i - 1)
            def _():
                denom = jnp.maximum(l_scr[...], 1e-20)                # empty-graph guard
                pooled = acc_scr[...] / denom                         # (BP, DP) f32
                out_ref[...] = jnp.dot(pooled, cw_ref[...],
                                       preferred_element_type=jnp.float32) + cb_ref[...]


# ----------------------------- wrapper -----------------------------

def _round_up(x, m):
    return ((x + m - 1) // m) * m


def _pad2(x, r, c):
    return jnp.pad(x, ((0, r - x.shape[0]), (0, c - x.shape[1])))


def gnn_codenet_forward(params, type_ids, token_ids, a_norm, graph_mask,
                        *, node_tile=128):
    # node_tile: 128 is fine everywhere; for large graphs prefer 256 on v6e/v7x
    # (2x256x256 MXU) and keep 128-multiples on v5e.

    # --- glue: embedding gathers + lane/sublane-friendly padding (plain JAX) ---
    h0 = jnp.concatenate(
        [params["type_emb"][type_ids], params["token_emb"][token_ids]], axis=1
    ).astype(jnp.float32)                                             # [N, D]
    n, d = h0.shape
    num_layers = len(params["gcn_w"])
    bsz = graph_mask.shape[0]
    n_classes = params["cls_w"].shape[1]

    NP = _round_up(max(n, node_tile), node_tile)   # node dim, padded
    DP = _round_up(d, 128)                         # feature dim, lane-dense
    BP = _round_up(bsz, 8)                         # graphs, sublane-dense
    CP = _round_up(n_classes, 128)                 # classes, lane-dense
    n_blk = NP // node_tile
    TN = node_tile

    h0_p = _pad2(h0, NP, DP).astype(jnp.bfloat16)
    a_p = _pad2(a_norm.astype(jnp.float32), NP, NP).astype(jnp.bfloat16)
    w_p = jnp.stack([_pad2(w, DP, DP) for w in params["gcn_w"]]).astype(jnp.bfloat16)  # [L,DP,DP]
    b_p = jnp.stack([_pad2(b, 1, DP) for b in params["gcn_b"]]).astype(jnp.float32)    # [L,1,DP]
    mask_p = _pad2(graph_mask.astype(jnp.float32), BP, NP)                             # [BP,NP]
    gw_p = _pad2(params["gate_w"].reshape(1, -1), 1, DP).astype(jnp.float32)           # [1,DP]
    gb_p = params["gate_b"].reshape(1, 1).astype(jnp.float32)                          # [1,1]
    cw_p = _pad2(params["cls_w"], DP, CP).astype(jnp.float32)                          # [DP,CP]
    cb_p = _pad2(params["cls_b"], 1, CP).astype(jnp.float32)                           # [1,CP]

    grid = (num_layers, n_blk, n_blk)

    out = pl.pallas_call(
        fused_gnn_kernel,
        out_shape=jax.ShapeDtypeStruct((BP, CP), jnp.float32),
        grid_spec=pltpu.PrefetchScalarGridSpec(
            num_scalar_prefetch=0,
            grid=grid,
            in_specs=[
                # h0: only needed at layer 0; pin to block 0 afterwards to skip re-DMA.
                pl.BlockSpec((TN, DP), lambda l, i, k: (jnp.where(l == 0, k, 0), 0)),
                # A_norm streamed as (TN, TN) tiles — double-buffered by the pipeline.
                pl.BlockSpec((TN, TN), lambda l, i, k: (i, k)),
                pl.BlockSpec((1, DP, DP), lambda l, i, k: (l, 0, 0)),        # W stack
                pl.BlockSpec((1, 1, DP), lambda l, i, k: (l, 0, 0)),         # b stack
                # mask: only needed during the last layer (pooling phase).
                pl.BlockSpec((BP, TN),
                             lambda l, i, k: (0, jnp.where(l == num_layers - 1, i, 0))),
                pl.BlockSpec((1, DP), lambda l, i, k: (0, 0)),               # gate w
                pl.BlockSpec((1, 1), lambda l, i, k: (0, 0)),                # gate b
                pl.BlockSpec((DP, CP), lambda l, i, k: (0, 0)),              # cls w
                pl.BlockSpec((1, CP), lambda l, i, k: (0, 0)),               # cls b
            ],
            out_specs=pl.BlockSpec((BP, CP), lambda l, i, k: (0, 0)),
            scratch_shapes=[
                pltpu.VMEM((2 * n_blk, TN, DP), jnp.bfloat16),   # h ping/pong (resident)
                pltpu.VMEM((TN, DP), jnp.float32),               # aggregation accumulator
                pltpu.VMEM((BP, 1), jnp.float32),                # online-softmax running max
                pltpu.VMEM((BP, 1), jnp.float32),                # online-softmax running sum
                pltpu.VMEM((BP, DP), jnp.float32),               # pooled accumulator
            ],
        ),
        compiler_params=pltpu.CompilerParams(
            # Layers / pooling accumulate through shared scratch -> all axes sequential.
            dimension_semantics=("arbitrary", "arbitrary", "arbitrary"),
            vmem_limit_bytes=32 * 1024 * 1024,   # fits v5e/v6e/v7x scoped budgets
        ),
    )(h0_p, a_p, w_p, b_p, mask_p, gw_p, gb_p, cw_p, cb_p)

    return out[:bsz, :n_classes]


# ----------------------------- pure-JAX reference (f32) -----------------------------

def reference_forward(params, type_ids, token_ids, a_norm, graph_mask):
    h = jnp.concatenate(
        [params["type_emb"][type_ids], params["token_emb"][token_ids]], axis=1
    ).astype(jnp.float32)
    for w, b in zip(params["gcn_w"], params["gcn_b"]):
        h = jnp.maximum(a_norm @ h @ w + b, 0.0)
    scores = h @ params["gate_w"] + params["gate_b"]                 # [N, 1]
    s = scores[:, 0][None, :]
    s = jnp.where(graph_mask > 0, s, -1e30)
    e = jnp.exp(s - s.max(-1, keepdims=True)) * graph_mask
    attn = e / e.sum(-1, keepdims=True)
    pooled = attn @ h
    return pooled @ params["cls_w"] + params["cls_b"]


# ----------------------------- main -----------------------------

if __name__ == "__main__":
    # Small shapes consistent with the module
    dim_model = 32
    n_classes = 8
    num_layers = 2
    token_vocab = 40
    type_vocab = 10
    num_graphs = 2
    nodes_per_graph = 8
    N = num_graphs * nodes_per_graph

    key = jax.random.PRNGKey(0)
    keys = jax.random.split(key, 10)

    params = {
        "type_emb": 0.1 * jax.random.normal(keys[0], (type_vocab, dim_model // 2), jnp.float32),
        "token_emb": 0.1 * jax.random.normal(keys[1], (token_vocab, dim_model // 2), jnp.float32),
        "gcn_w": [0.2 * jax.random.normal(keys[2 + i], (dim_model, dim_model), jnp.float32)
                  for i in range(num_layers)],
        "gcn_b": [0.05 * jax.random.normal(keys[4 + i], (1, dim_model), jnp.float32)
                  for i in range(num_layers)],
        "gate_w": 0.2 * jax.random.normal(keys[6], (dim_model, 1), jnp.float32),
        "gate_b": jnp.zeros((1, 1), jnp.float32),
        "cls_w": 0.2 * jax.random.normal(keys[7], (dim_model, n_classes), jnp.float32),
        "cls_b": jnp.zeros((1, n_classes), jnp.float32),
    }

    type_ids = jax.random.randint(keys[8], (N,), 0, type_vocab)
    token_ids = jax.random.randint(keys[9], (N,), 0, token_vocab)

    # Deterministic graph structure: 2 graphs, each a directed ring plus skip edges.
    src_list, dst_list = [], []
    for g in range(num_graphs):
        off = g * nodes_per_graph
        for i in range(nodes_per_graph):
            src_list.append(off + i)
            dst_list.append(off + (i + 1) % nodes_per_graph)
            src_list.append(off + i)
            dst_list.append(off + (i + 2) % nodes_per_graph)
    src = jnp.array(src_list, jnp.int32)
    dst = jnp.array(dst_list, jnp.int32)

    # Dense adjacency A[dst, src], GCN 'both' normalization (graph glue, plain JAX).
    A = jnp.zeros((N, N), jnp.float32).at[dst, src].add(1.0)
    out_deg = jnp.clip(A.sum(axis=0), 1.0, None)   # per source node
    in_deg = jnp.clip(A.sum(axis=1), 1.0, None)    # per destination node
    a_norm = (in_deg ** -0.5)[:, None] * A * (out_deg ** -0.5)[None, :]

    # Per-graph node membership mask [B, N]
    node_graph = jnp.repeat(jnp.arange(num_graphs), nodes_per_graph)
    graph_mask = (node_graph[None, :] == jnp.arange(num_graphs)[:, None]).astype(jnp.float32)

    logits = gnn_codenet_forward(params, type_ids, token_ids, a_norm, graph_mask)
    logits = jax.block_until_ready(logits)

    ref = reference_forward(params, type_ids, token_ids, a_norm, graph_mask)
    assert logits.shape == (num_graphs, n_classes)
    # bf16 MXU inputs (A, h, W) with f32 accumulation -> compare at bf16-level tolerance.
    assert jnp.allclose(logits, ref, atol=2e-2, rtol=2e-2), "mismatch vs reference"

    print("KERNEL_OK")
</pallas_src>

<mosaic_0001>
module attributes {stable_mosaic.version = 11 : i64} {
  func.func @fused_gnn_kernel(%arg0: i32, %arg1: i32, %arg2: i32, %arg3: memref<128x128xbf16, #tpu.memory_space<vmem>>, %arg4: memref<128x128xbf16, #tpu.memory_space<vmem>>, %arg5: memref<1x128x128xbf16, #tpu.memory_space<vmem>>, %arg6: memref<1x1x128xf32, #tpu.memory_space<vmem>>, %arg7: memref<8x128xf32, #tpu.memory_space<vmem>>, %arg8: memref<1x128xf32, #tpu.memory_space<vmem>>, %arg9: memref<1x1xf32, #tpu.memory_space<vmem>>, %arg10: memref<128x128xf32, #tpu.memory_space<vmem>>, %arg11: memref<1x128xf32, #tpu.memory_space<vmem>>, %arg12: memref<8x128xf32, #tpu.memory_space<vmem>>, %arg13: memref<2x128x128xbf16, #tpu.memory_space<vmem>>, %arg14: memref<128x128xf32, #tpu.memory_space<vmem>>, %arg15: memref<8x1xf32, #tpu.memory_space<vmem>>, %arg16: memref<8x1xf32, #tpu.memory_space<vmem>>, %arg17: memref<8x128xf32, #tpu.memory_space<vmem>>) attributes {dimension_semantics = [#tpu.dimension_semantics<arbitrary>, #tpu.dimension_semantics<arbitrary>, #tpu.dimension_semantics<arbitrary>], iteration_bounds = array<i64: 2, 1, 1>, scalar_prefetch = 0 : i64, scratch_operands = 5 : i64, tpu.core_type = #tpu.core_type<tc>, window_params = [{transform_indices = @transform_0, window_bounds = array<i64: 128, 128>}, {transform_indices = @transform_1, window_bounds = array<i64: 128, 128>}, {transform_indices = @transform_2, window_bounds = array<i64: 1, 128, 128>}, {transform_indices = @transform_3, window_bounds = array<i64: 1, 1, 128>}, {transform_indices = @transform_4, window_bounds = array<i64: 8, 128>}, {pipeline_mode = #tpu.pipeline_mode<synchronous>, transform_indices = @transform_5, window_bounds = array<i64: 1, 128>}, {pipeline_mode = #tpu.pipeline_mode<synchronous>, transform_indices = @transform_6, window_bounds = array<i64: 1, 1>}, {pipeline_mode = #tpu.pipeline_mode<synchronous>, transform_indices = @transform_7, window_bounds = array<i64: 128, 128>}, {pipeline_mode = #tpu.pipeline_mode<synchronous>, transform_indices = @transform_8, window_bounds = array<i64: 1, 128>}, {pipeline_mode = #tpu.pipeline_mode<synchronous>, transform_indices = @transform_9, window_bounds = array<i64: 8, 128>}]} {
    %c0_i32 = arith.constant 0 : i32
    %0 = arith.cmpi eq, %arg0, %c0_i32 : i32
    %c0_i32_0 = arith.constant 0 : i32
    %1 = arith.cmpi eq, %arg1, %c0_i32_0 : i32
    %2 = arith.andi %0, %1 : i1
    %3 = arith.extui %2 : i1 to i32
    %c0_i32_1 = arith.constant 0 : i32
    %4 = arith.cmpi ne, %3, %c0_i32_1 : i32
    scf.if %4 {
      %c0_18 = arith.constant 0 : index
      %c0_19 = arith.constant 0 : index
      %31 = vector.load %arg3[%c0_18, %c0_19] : memref<128x128xbf16, #tpu.memory_space<vmem>>, vector<128x128xbf16>
      %32 = arith.index_cast %arg2 : i32 to index
      %c0_20 = arith.constant 0 : index
      %c0_21 = arith.constant 0 : index
      %33 = vector.load %arg13[%32, %c0_20, %c0_21] : memref<2x128x128xbf16, #tpu.memory_space<vmem>>, vector<1x128x128xbf16>
      %34 = vector.shape_cast %33 : vector<1x128x128xbf16> to vector<128x128xbf16>
      %35 = vector.shape_cast %31 : vector<128x128xbf16> to vector<1x128x128xbf16>
      tpu.vector_store %arg13[%32, %c0_20, %c0_21], %35 {strides = array<i32>} : memref<2x128x128xbf16, #tpu.memory_space<vmem>>, vector<1x128x128xbf16>,
    } else {
    }
    %c0_i32_2 = arith.constant 0 : i32
    %5 = arith.cmpi eq, %arg2, %c0_i32_2 : i32
    %6 = arith.extui %5 : i1 to i32
    %c0_i32_3 = arith.constant 0 : i32
    %7 = arith.cmpi ne, %6, %c0_i32_3 : i32
    scf.if %7 {
      %cst_18 = arith.constant 0.000000e+00 : f32
      %31 = vector.broadcast %cst_18 : f32 to vector<128x128xf32>
      %c0_19 = arith.constant 0 : index
      %c0_20 = arith.constant 0 : index
      %32 = vector.load %arg14[%c0_19, %c0_20] : memref<128x128xf32, #tpu.memory_space<vmem>>, vector<128x128xf32>
      tpu.vector_store %arg14[%c0_19, %c0_20], %31 {strides = array<i32>} : memref<128x128xf32, #tpu.memory_space<vmem>>, vector<128x128xf32>,
    } else {
    }
    %c2_i32 = arith.constant 2 : i32
    %c0_i32_4 = arith.constant 0 : i32
    %8 = arith.cmpi eq, %c2_i32, %c0_i32_4 : i32
    %c1_i32 = arith.constant 1 : i32
    %9 = arith.select %8, %c1_i32, %c2_i32 : i32
    %10 = arith.remsi %arg0, %9 : i32
    %c0_i32_5 = arith.constant 0 : i32
    %11 = arith.cmpi ne, %10, %c0_i32_5 : i32
    %c0_i32_6 = arith.constant 0 : i32
    %12 = arith.cmpi slt, %10, %c0_i32_6 : i32
    %c0_i32_7 = arith.constant 0 : i32
    %13 = arith.cmpi slt, %9, %c0_i32_7 : i32
    %14 = arith.xori %12, %13 : i1
    %15 = arith.andi %14, %11 : i1
    %16 = arith.addi %10, %9 : i32
    %17 = arith.select %15, %16, %10 : i32
    %c1_i32_8 = arith.constant 1 : i32
    %18 = arith.muli %17, %c1_i32_8 : i32
    %19 = arith.addi %18, %arg2 : i32
    %20 = arith.index_cast %19 : i32 to index
    %c0 = arith.constant 0 : index
    %c0_9 = arith.constant 0 : index
    %21 = vector.load %arg13[%20, %c0, %c0_9] : memref<2x128x128xbf16, #tpu.memory_space<vmem>>, vector<1x128x128xbf16>
    %22 = vector.shape_cast %21 : vector<1x128x128xbf16> to vector<128x128xbf16>
    %c0_10 = arith.constant 0 : index
    %c0_11 = arith.constant 0 : index
    %23 = vector.load %arg14[%c0_10, %c0_11] : memref<128x128xf32, #tpu.memory_space<vmem>>, vector<128x128xf32>
    %c0_12 = arith.constant 0 : index
    %c0_13 = arith.constant 0 : index
    %24 = vector.load %arg4[%c0_12, %c0_13] : memref<128x128xbf16, #tpu.memory_space<vmem>>, vector<128x128xbf16>
    %cst = arith.constant dense<0.000000e+00> : vector<128x128xf32>
    %25 = tpu.matmul %24, %22, %cst {dimension_numbers = #tpu.dot_dimension_numbers<[1], [0], [0], [1], [0, 0, 1, 1], [], []>} : vector<128x128xbf16>, vector<128x128xbf16>, vector<128x128xf32> -> vector<128x128xf32>
    %26 = arith.addf %23, %25 : vector<128x128xf32>
    %c0_14 = arith.constant 0 : index
    %c0_15 = arith.constant 0 : index
    %27 = vector.load %arg14[%c0_14, %c0_15] : memref<128x128xf32, #tpu.memory_space<vmem>>, vector<128x128xf32>
    tpu.vector_store %arg14[%c0_14, %c0_15], %26 {strides = array<i32>} : memref<128x128xf32, #tpu.memory_space<vmem>>, vector<128x128xf32>,
    %c0_i32_16 = arith.constant 0 : i32
    %28 = arith.cmpi eq, %arg2, %c0_i32_16 : i32
    %29 = arith.extui %28 : i1 to i32
    %c0_i32_17 = arith.constant 0 : i32
    %30 = arith.cmpi ne, %29, %c0_i32_17 : i32
    scf.if %30 {
      %c0_18 = arith.constant 0 : index
      %c0_19 = arith.constant 0 : index
      %31 = vector.load %arg14[%c0_18, %c0_19] : memref<128x128xf32, #tpu.memory_space<vmem>>, vector<128x128xf32>
      %32 = arith.truncf %31 : vector<128x128xf32> to vector<128x128xbf16>
      %c0_20 = arith.constant 0 : index
      %c0_21 = arith.constant 0 : index
      %c0_22 = arith.constant 0 : index
      %33 = vector.load %arg5[%c0_20, %c0_21, %c0_22] : memref<1x128x128xbf16, #tpu.memory_space<vmem>>, vector<1x128x128xbf16>
      %34 = vector.shape_cast %33 : vector<1x128x128xbf16> to vector<128x128xbf16>
      %cst_23 = arith.constant dense<0.000000e+00> : vector<128x128xf32>
      %35 = tpu.matmul %32, %34, %cst_23 {dimension_numbers = #tpu.dot_dimension_numbers<[1], [0], [0], [1], [0, 0, 1, 1], [], []>} : vector<128x128xbf16>, vector<128x128xbf16>, vector<128x128xf32> -> vector<128x128xf32>
      %c0_24 = arith.constant 0 : index
      %c0_25 = arith.constant 0 : index
      %c0_26 = arith.constant 0 : index
      %36 = vector.load %arg6[%c0_24, %c0_25, %c0_26] : memref<1x1x128xf32, #tpu.memory_space<vmem>>, vector<1x1x128xf32>
      %37 = vector.shape_cast %36 : vector<1x1x128xf32> to vector<1x128xf32>
      %38 = vector.broadcast %37 : vector<1x128xf32> to vector<128x128xf32>
      %39 = arith.addf %35, %38 : vector<128x128xf32>
      %cst_27 = arith.constant 0.000000e+00 : f32
      %40 = vector.broadcast %cst_27 : f32 to vector<128x128xf32>
      %41 = arith.maximumf %39, %40 : vector<128x128xf32>
      %c1_i32_28 = arith.constant 1 : i32
      %42 = arith.addi %arg0, %c1_i32_28 : i32
      %c2_i32_29 = arith.constant 2 : i32
      %c0_i32_30 = arith.constant 0 : i32
      %43 = arith.cmpi eq, %c2_i32_29, %c0_i32_30 : i32
      %c1_i32_31 = arith.constant 1 : i32
      %44 = arith.select %43, %c1_i32_31, %c2_i32_29 : i32
      %45 = arith.remsi %42, %44 : i32
      %c0_i32_32 = arith.constant 0 : i32
      %46 = arith.cmpi ne, %45, %c0_i32_32 : i32
      %c0_i32_33 = arith.constant 0 : i32
      %47 = arith.cmpi slt, %45, %c0_i32_33 : i32
      %c0_i32_34 = arith.constant 0 : i32
      %48 = arith.cmpi slt, %44, %c0_i32_34 : i32
      %49 = arith.xori %47, %48 : i1
      %50 = arith.andi %49, %46 : i1
      %51 = arith.addi %45, %44 : i32
      %52 = arith.select %50, %51, %45 : i32
      %c1_i32_35 = arith.constant 1 : i32
      %53 = arith.muli %52, %c1_i32_35 : i32
      %54 = arith.truncf %41 : vector<128x128xf32> to vector<128x128xbf16>
      %55 = arith.addi %53, %arg1 : i32
      %56 = arith.index_cast %55 : i32 to index
      %c0_36 = arith.constant 0 : index
      %c0_37 = arith.constant 0 : index
      %57 = vector.load %arg13[%56, %c0_36, %c0_37] : memref<2x128x128xbf16, #tpu.memory_space<vmem>>, vector<1x128x128xbf16>
      %58 = vector.shape_cast %57 : vector<1x128x128xbf16> to vector<128x128xbf16>
      %59 = vector.shape_cast %54 : vector<128x128xbf16> to vector<1x128x128xbf16>
      tpu.vector_store %arg13[%56, %c0_36, %c0_37], %59 {strides = array<i32>} : memref<2x128x128xbf16, #tpu.memory_space<vmem>>, vector<1x128x128xbf16>,
      %c1_i32_38 = arith.constant 1 : i32
      %60 = arith.cmpi eq, %arg0, %c1_i32_38 : i32
      %61 = arith.extui %60 : i1 to i32
      %c0_i32_39 = arith.constant 0 : i32
      %62 = arith.cmpi ne, %61, %c0_i32_39 : i32
      scf.if %62 {
        %c0_i32_40 = arith.constant 0 : i32
        %63 = arith.cmpi eq, %arg1, %c0_i32_40 : i32
        %64 = arith.extui %63 : i1 to i32
        %c0_i32_41 = arith.constant 0 : i32
        %65 = arith.cmpi ne, %64, %c0_i32_41 : i32
        scf.if %65 {
          %cst_68 = arith.constant -1.000000e+30 : f32
          %108 = vector.broadcast %cst_68 : f32 to vector<8x1xf32>
          %c0_69 = arith.constant 0 : index
          %c0_70 = arith.constant 0 : index
          %109 = vector.load %arg15[%c0_69, %c0_70] : memref<8x1xf32, #tpu.memory_space<vmem>>, vector<8x1xf32>
          tpu.vector_store %arg15[%c0_69, %c0_70], %108 {strides = array<i32>} : memref<8x1xf32, #tpu.memory_space<vmem>>, vector<8x1xf32>,
          %cst_71 = arith.constant 0.000000e+00 : f32
          %110 = vector.broadcast %cst_71 : f32 to vector<8x1xf32>
          %c0_72 = arith.constant 0 : index
          %c0_73 = arith.constant 0 : index
          %111 = vector.load %arg16[%c0_72, %c0_73] : memref<8x1xf32, #tpu.memory_space<vmem>>, vector<8x1xf32>
          tpu.vector_store %arg16[%c0_72, %c0_73], %110 {strides = array<i32>} : memref<8x1xf32, #tpu.memory_space<vmem>>, vector<8x1xf32>,
          %cst_74 = arith.constant 0.000000e+00 : f32
          %112 = vector.broadcast %cst_74 : f32 to vector<8x128xf32>
          %c0_75 = arith.constant 0 : index
          %c0_76 = arith.constant 0 : index
          %113 = vector.load %arg17[%c0_75, %c0_76] : memref<8x128xf32, #tpu.memory_space<vmem>>, vector<8x128xf32>
          tpu.vector_store %arg17[%c0_75, %c0_76], %112 {strides = array<i32>} : memref<8x128xf32, #tpu.memory_space<vmem>>, vector<8x128xf32>,
        } else {
        }
        %c0_42 = arith.constant 0 : index
        %c0_43 = arith.constant 0 : index
        %66 = vector.load %arg7[%c0_42, %c0_43] : memref<8x128xf32, #tpu.memory_space<vmem>>, vector<8x128xf32>
        %c0_44 = arith.constant 0 : index
        %c0_45 = arith.constant 0 : index
        %67 = vector.load %arg8[%c0_44, %c0_45] : memref<1x128xf32, #tpu.memory_space<vmem>>, vector<1x128xf32>
        %68 = vector.broadcast %67 : vector<1x128xf32> to vector<128x128xf32>
        %69 = arith.mulf %41, %68 : vector<128x128xf32>
        %cst_46 = arith.constant dense<0.000000e+00> : vector<128xf32>
        %70 = vector.multi_reduction <add>, %69, %cst_46 [1] : vector<128x128xf32> to vector<128xf32>
        %71 = vector.shape_cast %70 : vector<128xf32> to vector<128x1xf32>
        %c0_47 = arith.constant 0 : index
        %c0_48 = arith.constant 0 : index
        %72 = vector.load %arg9[%c0_47, %c0_48] : memref<1x1xf32, #tpu.memory_space<vmem>>, vector<1x1xf32>
        %73 = vector.broadcast %72 : vector<1x1xf32> to vector<128x1xf32>
        %74 = arith.addf %71, %73 : vector<128x1xf32>
        %cst_49 = arith.constant 0.000000e+00 : f32
        %75 = vector.broadcast %cst_49 : f32 to vector<8x128xf32>
        %76 = arith.cmpf ogt, %66, %75 : vector<8x128xf32>
        %77 = tpu.transpose %74, [1, 0] : vector<128x1xf32> -> vector<1x128xf32>
        %cst_50 = arith.constant -1.000000e+30 : f32
        %78 = vector.shape_cast %77 : vector<1x128xf32> to vector<1x128xf32>
        %79 = vector.broadcast %78 : vector<1x128xf32> to vector<8x128xf32>
        %80 = vector.broadcast %cst_50 : f32 to vector<8x128xf32>
        %81 = arith.select %76, %79, %80 : vector<8x128xi1>, vector<8x128xf32>
        %c0_51 = arith.constant 0 : index
        %c0_52 = arith.constant 0 : index
        %82 = vector.load %arg15[%c0_51, %c0_52] : memref<8x1xf32, #tpu.memory_space<vmem>>, vector<8x1xf32>
        %cst_53 = arith.constant dense<0xFF800000> : vector<8xf32>
        %83 = vector.multi_reduction <maximumf>, %81, %cst_53 [1] : vector<8x128xf32> to vector<8xf32>
        %84 = vector.shape_cast %83 : vector<8xf32> to vector<8x1xf32>
        %85 = arith.maximumf %82, %84 : vector<8x1xf32>
        %86 = arith.subf %82, %85 : vector<8x1xf32>
        %87 = math.exp %86 : vector<8x1xf32>
        %88 = vector.broadcast %85 : vector<8x1xf32> to vector<8x128xf32>
        %89 = arith.subf %81, %88 : vector<8x128xf32>
        %90 = math.exp %89 : vector<8x128xf32>
        %91 = arith.mulf %90, %66 : vector<8x128xf32>
        %c0_54 = arith.constant 0 : index
        %c0_55 = arith.constant 0 : index
        %92 = vector.load %arg16[%c0_54, %c0_55] : memref<8x1xf32, #tpu.memory_space<vmem>>, vector<8x1xf32>
        %93 = arith.mulf %87, %92 : vector<8x1xf32>
        %cst_56 = arith.constant dense<0.000000e+00> : vector<8xf32>
        %94 = vector.multi_reduction <add>, %91, %cst_56 [1] : vector<8x128xf32> to vector<8xf32>
        %95 = vector.shape_cast %94 : vector<8xf32> to vector<8x1xf32>
        %96 = arith.addf %93, %95 : vector<8x1xf32>
        %c0_57 = arith.constant 0 : index
        %c0_58 = arith.constant 0 : index
        %97 = vector.load %arg16[%c0_57, %c0_58] : memref<8x1xf32, #tpu.memory_space<vmem>>, vector<8x1xf32>
        tpu.vector_store %arg16[%c0_57, %c0_58], %96 {strides = array<i32>} : memref<8x1xf32, #tpu.memory_space<vmem>>, vector<8x1xf32>,
        %c0_59 = arith.constant 0 : index
        %c0_60 = arith.constant 0 : index
        %98 = vector.load %arg17[%c0_59, %c0_60] : memref<8x128xf32, #tpu.memory_space<vmem>>, vector<8x128xf32>
        %99 = vector.broadcast %87 : vector<8x1xf32> to vector<8x128xf32>
        %100 = arith.mulf %99, %98 : vector<8x128xf32>
        %cst_61 = arith.constant dense<0.000000e+00> : vector<8x128xf32>
        %101 = tpu.matmul %91, %41, %cst_61 {dimension_numbers = #tpu.dot_dimension_numbers<[1], [0], [0], [1], [0, 0, 1, 1], [], []>} : vector<8x128xf32>, vector<128x128xf32>, vector<8x128xf32> -> vector<8x128xf32>
        %102 = arith.addf %100, %101 : vector<8x128xf32>
        %c0_62 = arith.constant 0 : index
        %c0_63 = arith.constant 0 : index
        %103 = vector.load %arg17[%c0_62, %c0_63] : memref<8x128xf32, #tpu.memory_space<vmem>>, vector<8x128xf32>
        tpu.vector_store %arg17[%c0_62, %c0_63], %102 {strides = array<i32>} : memref<8x128xf32, #tpu.memory_space<vmem>>, vector<8x128xf32>,
        %c0_64 = arith.constant 0 : index
        %c0_65 = arith.constant 0 : index
        %104 = vector.load %arg15[%c0_64, %c0_65] : memref<8x1xf32, #tpu.memory_space<vmem>>, vector<8x1xf32>
        tpu.vector_store %arg15[%c0_64, %c0_65], %85 {strides = array<i32>} : memref<8x1xf32, #tpu.memory_space<vmem>>, vector<8x1xf32>,
        %c0_i32_66 = arith.constant 0 : i32
        %105 = arith.cmpi eq, %arg1, %c0_i32_66 : i32
        %106 = arith.extui %105 : i1 to i32
        %c0_i32_67 = arith.constant 0 : i32
        %107 = arith.cmpi ne, %106, %c0_i32_67 : i32
        scf.if %107 {
          %c0_68 = arith.constant 0 : index
          %c0_69 = arith.constant 0 : index
          %108 = vector.load %arg16[%c0_68, %c0_69] : memref<8x1xf32, #tpu.memory_space<vmem>>, vector<8x1xf32>
          %cst_70 = arith.constant 9.99999968E-21 : f32
          %109 = vector.broadcast %cst_70 : f32 to vector<8x1xf32>
          %110 = arith.maximumf %108, %109 : vector<8x1xf32>
          %c0_71 = arith.constant 0 : index
          %c0_72 = arith.constant 0 : index
          %111 = vector.load %arg17[%c0_71, %c0_72] : memref<8x128xf32, #tpu.memory_space<vmem>>, vector<8x128xf32>
          %112 = vector.broadcast %110 : vector<8x1xf32> to vector<8x128xf32>
          %113 = arith.divf %111, %112 : vector<8x128xf32>
          %c0_73 = arith.constant 0 : index
          %c0_74 = arith.constant 0 : index
          %114 = vector.load %arg10[%c0_73, %c0_74] : memref<128x128xf32, #tpu.memory_space<vmem>>, vector<128x128xf32>
          %cst_75 = arith.constant dense<0.000000e+00> : vector<8x128xf32>
          %115 = tpu.matmul %113, %114, %cst_75 {dimension_numbers = #tpu.dot_dimension_numbers<[1], [0], [0], [1], [0, 0, 1, 1], [], []>} : vector<8x128xf32>, vector<128x128xf32>, vector<8x128xf32> -> vector<8x128xf32>
          %c0_76 = arith.constant 0 : index
          %c0_77 = arith.constant 0 : index
          %116 = vector.load %arg11[%c0_76, %c0_77] : memref<1x128xf32, #tpu.memory_space<vmem>>, vector<1x128xf32>
          %117 = vector.broadcast %116 : vector<1x128xf32> to vector<8x128xf32>
          %118 = arith.addf %115, %117 : vector<8x128xf32>
          %c0_78 = arith.constant 0 : index
          %c0_79 = arith.constant 0 : index
          %119 = vector.load %arg12[%c0_78, %c0_79] : memref<8x128xf32, #tpu.memory_space<vmem>>, vector<8x128xf32>
          tpu.vector_store %arg12[%c0_78, %c0_79], %118 {strides = array<i32>} : memref<8x128xf32, #tpu.memory_space<vmem>>, vector<8x128xf32>,
        } else {
        }
      } else {
      }
    } else {
    }
    return
  }
  func.func @transform_0(%arg0: i32, %arg1: i32, %arg2: i32) -> (i32, i32) {
    %c0_i32 = arith.constant 0 : i32
    %0 = arith.cmpi eq, %arg0, %c0_i32 : i32
    %c0_i32_0 = arith.constant 0 : i32
    %1 = arith.select %0, %arg2, %c0_i32_0 : i32
    %c0_i32_1 = arith.constant 0 : i32
    %c0_i32_2 = arith.constant 0 : i32
    return %1, %c0_i32_1 : i32, i32
  }
  func.func @transform_1(%arg0: i32, %arg1: i32, %arg2: i32) -> (i32, i32) {
    %c0_i32 = arith.constant 0 : i32
    return %arg1, %arg2 : i32, i32
  }
  func.func @transform_2(%arg0: i32, %arg1: i32, %arg2: i32) -> (i32, i32, i32) {
    %c0_i32 = arith.constant 0 : i32
    %c0_i32_0 = arith.constant 0 : i32
    %c0_i32_1 = arith.constant 0 : i32
    return %arg0, %c0_i32, %c0_i32_0 : i32, i32, i32
  }
  func.func @transform_3(%arg0: i32, %arg1: i32, %arg2: i32) -> (i32, i32, i32) {
    %c0_i32 = arith.constant 0 : i32
    %c0_i32_0 = arith.constant 0 : i32
    %c0_i32_1 = arith.constant 0 : i32
    return %arg0, %c0_i32, %c0_i32_0 : i32, i32, i32
  }
  func.func @transform_4(%arg0: i32, %arg1: i32, %arg2: i32) -> (i32, i32) {
    %c1_i32 = arith.constant 1 : i32
    %0 = arith.cmpi eq, %arg0, %c1_i32 : i32
    %c0_i32 = arith.constant 0 : i32
    %1 = arith.select %0, %arg1, %c0_i32 : i32
    %c0_i32_0 = arith.constant 0 : i32
    %c0_i32_1 = arith.constant 0 : i32
    return %c0_i32_0, %1 : i32, i32
  }
  func.func @transform_5(%arg0: i32, %arg1: i32, %arg2: i32) -> (i32, i32) {
    %c0_i32 = arith.constant 0 : i32
    %c0_i32_0 = arith.constant 0 : i32
    %c0_i32_1 = arith.constant 0 : i32
    return %c0_i32, %c0_i32_0 : i32, i32
  }
  func.func @transform_6(%arg0: i32, %arg1: i32, %arg2: i32) -> (i32, i32) {
    %c0_i32 = arith.constant 0 : i32
    %c0_i32_0 = arith.constant 0 : i32
    %c0_i32_1 = arith.constant 0 : i32
    return %c0_i32, %c0_i32_0 : i32, i32
  }
  func.func @transform_7(%arg0: i32, %arg1: i32, %arg2: i32) -> (i32, i32) {
    %c0_i32 = arith.constant 0 : i32
    %c0_i32_0 = arith.constant 0 : i32
    %c0_i32_1 = arith.constant 0 : i32
    return %c0_i32, %c0_i32_0 : i32, i32
  }
  func.func @transform_8(%arg0: i32, %arg1: i32, %arg2: i32) -> (i32, i32) {
    %c0_i32 = arith.constant 0 : i32
    %c0_i32_0 = arith.constant 0 : i32
    %c0_i32_1 = arith.constant 0 : i32
    return %c0_i32, %c0_i32_0 : i32, i32
  }
  func.func @transform_9(%arg0: i32, %arg1: i32, %arg2: i32) -> (i32, i32) {
    %c0_i32 = arith.constant 0 : i32
    %c0_i32_0 = arith.constant 0 : i32
    %c0_i32_1 = arith.constant 0 : i32
    return %c0_i32, %c0_i32_0 : i32, i32
  }
}

</mosaic_0001>

<bundles_post_ra>
// kernel: tpu_custom_call.1
= control target key start
LH: loop header
LB: loop body
LE: loop exit
PB: predicated region body
PF: predicated region fallthrough
CT: control target
= control target key end

     0   :  { %s2659_s0 = inlined_call_operand.hbm [shape: bf16[128,128], index: 0, kind: input, shape index: {}]   ;;  %s2660_s1 = inlined_call_operand.hbm [shape: bf16[128,128], index: 1, kind: input, shape index: {}]   ;;  %s2661_s2 = inlined_call_operand.hbm [shape: bf16[2,128,128], index: 2, kind: input, shape index: {}]   ;;  %s2662_s3 = inlined_call_operand.vmem [shape: f32[2,1,128], index: 3, kind: input, shape index: {}]   ;;  %s2663_s4 = inlined_call_operand.vmem [shape: f32[8,128], index: 4, kind: input, shape index: {}]   ;;  %s2664_s5 = inlined_call_operand.vmem [shape: f32[1,128], index: 5, kind: input, shape index: {}]   ;;  %s2665_s6 = inlined_call_operand.<no memory space> [shape: f32[1,1], index: 6, kind: input, shape index: {}]   ;;  %s2666_s7 = inlined_call_operand.hbm [shape: f32[128,128], index: 7, kind: input, shape index: {}]   ;;  %s2667_s8 = inlined_call_operand.vmem [shape: f32[1,128], index: 8, kind: input, shape index: {}]   ;;  %s2668_s9 = inlined_call_operand.hbm [shape: f32[8,128], index: 9, kind: output, shape index: {}]  }
   0x1   :  { %2681 = sst [smem:[#allocation22_spill]] %s2660_s1  ;;  %v14_v0 = vstv %s2665_s6 }
   0x2   :  { %2682 = sst [smem:[#allocation23_spill]] %s2668_s9  ;;  %15 = vst [vmem:[#allocation7] sm:$0x1] %v14_v0 }
   0x3   :  { %16 = vsyncpa [#allocation9], 0 }
   0x4   :  { %18 = vsyncpa [#allocation9 + $0x1], 0 }
   0x5   :  { %19 = vsyncpa [#allocation12], 0 }
   0x6   :  { %20 = vsyncpa [#allocation10], 0  ;;  %s2270_s11 = smov 0   ;;  %s2272_s12 = smov 0  }
   0x7   :  { %s2274_s13 = smov 0   ;;  %s2276_s14 = smov 0  }
   0x8   :  { %s2278_s15 = smov 0   ;;  %s2280_s16 = smov 0  }
   0x9 LB: > { %2683 = sst [smem:[#allocation21_spill]] %s2201_s16  ;;  %s2299_s6 = sadd.s32 4294967295, %s2201_s16   ;;  %s2201_s16 = sphi %s2280_s16, %s26_s16   ;;  %s2197_s15 = sphi %s2278_s15, %s2716_s15   ;;  %s2193_s14 = sphi %s2276_s14, %s2715_s14   ;;  %s2189_s13 = sphi %s2274_s13, %s2714_s13   ;;  %s2185_s12 = sphi %s2272_s12, %s2713_s12   ;;  %s2181_s11 = sphi %s2270_s11, %s2712_s11  }
   0xa   : > { %p123_p1 = scmp.ne.s32.totalorder %s2185_s12, %s2181_s11  ;;  %p2669_p2 = scmp.eq.s32.totalorder %s2299_s6, 0 }
   0xb   : > { %p1551_p3 = scmp.ge.s32.totalorder %s2201_s16, 1  ;;  %p295_p4 = scmp.lt.s32.totalorder %s2201_s16, 3 }
   0xc   : > { %p2309_p5 = por %p2669_p2, %p123_p1  ;;  %s2203_s19 = smov [#allocation11]  }
   0xd   : > { %p2313_p6 = pnand %p1551_p3, %p295_p4  ;;  %s311_s20 = sshll.u32 %s2203_s19, 4  ;;  %s312_s20 = int_to_ptr.vmem [resolvable:$true] %s311_s20 }
   0xe   : > { %s2684_s17 = scalar_select %p2309_p5, 1, 0 }
   0xf   : > { %s2685_s18 = scalar_select %p2313_p6, 1, 0 }
  0x10   : > { %p1879_p7 = pneg %p2313_p6  ;;  %s347_s22 = sand.u32 1, %s2201_s16  }
  0x11   : > { %s2687_s1 = sld [smem:[#allocation22_spill]] }
  0x12   : > { %p2321_p8 = pnand %p1879_p7, %p2669_p2 }
  0x14   : > { %s2686_s21 = scalar_select %p2321_p8, 1, 0 }
  0x15   : > { %p2674_p12 = pneg %p2321_p8 }
  0x17   : > { %s1995_s25 = scalar_lea.hbm %s2687_s1, 1024 }
  0x18   : > { %p1996_p11 = scmp.ne.s32.totalorder %s2687_s1, %s1995_s25  ;;  %p2002_p3 = scmp.lt.u32.totalorder %s1995_s25, %s2687_s1 }
  0x1a   : > { %p1998_p13 = pnand %p2674_p12, %p1996_p11 }
  0x1c   : > { %p1999_p1 = pneg %p1998_p13 }
  0x1e   : > { %p2004_p4 = pnand %p2002_p3, %p1999_p1 }
  0x20   : > { %2007 = shalt.err (!%p2004_p4)
}
  0x21   : > { %s2008_s30 = scalar_lea.vmem %s312_s20, 1024  ;;  %p2016_p9 = scmp.lt.s32.totalorder %s312_s20, %s312_s20 }
  0x22   : > { %p2009_p7 = scmp.ne.s32.totalorder %s312_s20, %s2008_s30  ;;  %p2017_p0 = scmp.lt.s32.totalorder %s2008_s30, %s2008_s30 }
  0x24   : > { %p2011_p2 = pnand %p2009_p7, %p2674_p12  ;;  %p2018_p5 = por %p2017_p0, %p2016_p9 }
  0x26   : > { %p2012_p10 = pneg %p2011_p2 }
  0x28   : > { %p2019_p6 = pnand %p2018_p5, %p2012_p10 }
  0x2a   : > { %2022 = shalt.err (!%p2019_p6)
}
  0x2b   : > { %s2672_s10 = smov 64   ;;  %s2680_s11 = smov 4  }
  0x2c   : > { %1882 = dma.hbm_to_vmem [thread:$0]  (!%p2321_p8), %s2687_s1, 1024, %s312_s20, [#allocation12], %s2672_s10, %s2672_s10, %s2680_s11  }
  0x2d   : > { %p2688_p0 = scmp.ne.s32.totalorder %s2189_s13, %s2185_s12  ;;  %p2689_p2 = scmp.eq.s32.totalorder %s2201_s16, 0 }
  0x2e   : > { %p2691_p9 = scmp.lt.s32.totalorder %s2201_s16, 2  ;;  %s2206_s25 = smov [#allocation8]  }
  0x2f   : > { %p119_p5 = por %p2689_p2, %p2688_p0  ;;  %p2690_p6 = pmov %p2689_p2 }
  0x30   : > { %s360_s26 = sshll.u32 %s2206_s25, 4  ;;  %p2693_p11 = pmov %p2691_p9  ;;  %s361_s26 = int_to_ptr.vmem [resolvable:$true] %s360_s26 }
  0x31   : > { %p2362_p10 = pnand %p2691_p9, %p2690_p6  ;;  %s2372_s28 = scalar_lea.sflag [#allocation9], %s347_s22 }
  0x32   : > { %p2368_p13 = pnand %p2693_p11, %p119_p5  ;;  %s2023_s30 = scalar_lea.hbm %s2659_s0, 1024 }
  0x33   : > { %p2024_p1 = scmp.ne.s32.totalorder %s2659_s0, %s2023_s30  ;;  %p2025_p3 = pneg %p2362_p10 }
  0x34   : > { %s2694_s27 = scalar_select %p2368_p13, 1, 0 }
  0x35   : > { %p2026_p4 = pnand %p2025_p3, %p2024_p1  ;;  %p2030_p0 = scmp.lt.u32.totalorder %s2023_s30, %s2659_s0 }
  0x37   : > { %p2027_p7 = pneg %p2026_p4 }
  0x39   : > { %p2032_p2 = pnand %p2030_p0, %p2027_p7 }
  0x3b   : > { %2035 = shalt.err (!%p2032_p2)
}
  0x3c   : > { %s2036_s22 = scalar_lea.vmem %s361_s26, 1024  ;;  %s2043_s20 = scalar_lea.vmem %s361_s26, 2048 }
  0x3d   : > { %p2037_p5 = scmp.ne.s32.totalorder %s361_s26, %s2036_s22  ;;  %p2044_p11 = scmp.lt.s32.totalorder %s361_s26, %s361_s26 }
  0x3e   : > { %p2045_p12 = scmp.lt.s32.totalorder %s2043_s20, %s2036_s22 }
  0x3f   : > { %p2039_p6 = pnand %p2037_p5, %p2025_p3 }
  0x40   : > { %p2046_p13 = por %p2045_p12, %p2044_p11 }
  0x41   : > { %p2040_p9 = pneg %p2039_p6 }
  0x43   : > { %p2047_p8 = pnand %p2046_p13, %p2040_p9 }
  0x45   : > { %2050 = shalt.err (!%p2047_p8)
}
  0x46   : > { %s2695_s29 = smov 64   ;;  %s2207_s19 = smov [#allocation14]  }
  0x47   : > { %1889 = dma.hbm_to_vmem [thread:$0]  (!%p2362_p10), %s2659_s0, 1024, %s361_s26, %s2372_s28, %s2695_s29, %s2695_s29, %s2680_s11  }
  0x48   : > { %s330_s23 = sshll.u32 %s2207_s19, 4  ;;  %s2051_s22 = scalar_lea.hbm %s2666_s7, 2048  ;;  %s331_s23 = int_to_ptr.vmem [resolvable:$true] %s330_s23 }
  0x49   : > { %p2052_p8 = scmp.ne.s32.totalorder %s2666_s7, %s2051_s22  ;;  %p2696_p12 = scmp.ne.s32.totalorder %s2686_s21, 0 }
  0x4a   : > { %p2058_p4 = scmp.lt.u32.totalorder %s2051_s22, %s2666_s7 }
  0x4b   : > { %p2697_p13 = pneg %p2696_p12 }
  0x4d   : > { %p2054_p1 = pnand %p2052_p8, %p2697_p13 }
  0x4f   : > { %p2055_p3 = pneg %p2054_p1 }
  0x51   : > { %p2060_p10 = pnand %p2058_p4, %p2055_p3 }
  0x53   : > { %2063 = shalt.err (!%p2060_p10)
}
  0x54   : > { %s2064_s26 = scalar_lea.vmem %s331_s23, 2048  ;;  %p2698_p0 = pmov %p2697_p13 }
  0x55   : > { %p2065_p7 = scmp.ne.s32.totalorder %s331_s23, %s2064_s26  ;;  %p2072_p6 = scmp.lt.s32.totalorder %s331_s23, %s331_s23 }
  0x56   : > { %p2073_p9 = scmp.lt.s32.totalorder %s2064_s26, %s2064_s26 }
  0x57   : > { %p2067_p2 = pnand %p2065_p7, %p2698_p0 }
  0x58   : > { %p2074_p11 = por %p2073_p9, %p2072_p6 }
  0x59   : > { %p2068_p5 = pneg %p2067_p2 }
  0x5b   : > { %p2075_p8 = pnand %p2074_p11, %p2068_p5 }
  0x5d   : > { %2078 = shalt.err (!%p2075_p8)
}
  0x5e   : > { %s2208_s1 = smov 128   ;;  %s2209_s9 = smov 8  }
  0x5f   : > { %1885 = dma.hbm_to_vmem [thread:$0]  (!%p2696_p12), %s2666_s7, 2048, %s331_s23, [#allocation12], %s2208_s1, %s2208_s1, %s2209_s9  }
  0x60   : > { %s372_s30 = sand.u32 1, %s2189_s13   ;;  %s45_s19 = sadd.s32 1, %s2197_s15 }
  0x61   : > { %s1556_s25 = sshll.u32 %s372_s30, 6  ;;  %p47_p13 = scmp.ge.s32.totalorder %s45_s19, 2 }
  0x62   : > { %s1609_s22 = sshll.u32 %s2197_s15, 10  ;;  %s374_s20 = scalar_lea.vmem [#allocation13], %s1556_s25 }
  0x63   : > { %s381_s24 = sshll.u32 %s374_s20, 4  ;;  %s2718_s19 = smov (%p47_p13, %s45_s19), 0  ;;  %s2424_s24 = int_to_ptr.vmem [resolvable:$true] %s381_s24 }
  0x64   : > { %s2422_s21 = scalar_lea.hbm %s2661_s2, %s1609_s22  ;;  %s107_s23 = ssub.s32 %s2197_s15, %s2718_s19 }
  0x65   : > { %s110_s1 = sadd.s32 1, %s2189_s13  ;;  %p2429_p12 = scmp.eq.s32.totalorder %s107_s23, 0 }
  0x66   : > { %s2079_s16 = scalar_lea.hbm %s2422_s21, 1024  ;;  %p2700_p3 = scmp.ne.s32.totalorder %s2694_s27, 0 }
  0x67   : > { %p2080_p1 = scmp.ne.s32.totalorder %s2422_s21, %s2079_s16  ;;  %s2084_s30 = scalar_lea.hbm %s2661_s2, 2048 }
  0x68   : > { %p2081_p4 = pneg %p2700_p3  ;;  %p2085_p0 = scmp.lt.u32.totalorder %s2422_s21, %s2661_s2 }
  0x69   : > { %p2086_p2 = scmp.lt.u32.totalorder %s2084_s30, %s2079_s16  ;;  %p2088_p6 = scmp.lt.u32.totalorder %s2079_s16, %s2422_s21 }
  0x6a   : > { %p2082_p10 = pnand %p2081_p4, %p2080_p1 }
  0x6b   : > { %p2087_p5 = por %p2086_p2, %p2085_p0 }
  0x6c   : > { %p2083_p7 = pneg %p2082_p10 }
  0x6d   : > { %p2089_p9 = por %p2088_p6, %p2087_p5 }
  0x6f   : > { %p2090_p11 = pnand %p2089_p9, %p2083_p7 }
  0x71   : > { %2093 = shalt.err (!%p2090_p11)
}
  0x72   : > { %s2094_s20 = scalar_lea.vmem %s2424_s24, 1024  ;;  %s2210_s26 = smov [#allocation13]  }
  0x73   : > { %p2095_p8 = scmp.ne.s32.totalorder %s2424_s24, %s2094_s20  ;;  %s2099_s23 = sshll.u32 %s2210_s26, 4  ;;  %s2100_s23 = int_to_ptr.vmem [resolvable:$false] %s2099_s23 }
  0x74   : > { %s2101_s11 = scalar_lea.vmem %s2100_s23, 2048  ;;  %p2102_p10 = scmp.lt.s32.totalorder %s2424_s24, %s2100_s23 }
  0x75   : > { %p2097_p13 = pnand %p2095_p8, %p2081_p4  ;;  %p2103_p0 = scmp.lt.s32.totalorder %s2101_s11, %s2094_s20 }
  0x77   : > { %p2098_p1 = pneg %p2097_p13  ;;  %p2104_p2 = por %p2103_p0, %p2102_p10 }
  0x79   : > { %p2105_p5 = pnand %p2104_p2, %p2098_p1 }
  0x7b   : > { %2108 = shalt.err (!%p2105_p5)
}
  0x7c   : > { %s2701_s16 = smov 4   ;;  %p2702_p4 = scmp.ne.s32.totalorder %s2685_s18, 0 }
  0x7d   : > { %1892 = dma.hbm_to_vmem [thread:$0]  (!%p2700_p3), %s2422_s21, 1024, %s2424_s24, %s2372_s28, %s2695_s29, %s2695_s29, %s2701_s16  }
  0x7e   : > { %s2467_s10 = scalar_select %p2429_p12, %s2189_s13, %s110_s1  }
  0x7f   : > { %410 = sbr.rel (%p2702_p4) target bundleno = 1742 (0x6ce), region = 56  ;;  %s412_s27 = sand.u32 (!%p2702_p4), 1, %s2299_s6  }
  0x80   : > { %s413_s30 = scalar_lea.sflag (!%p2702_p4), [#allocation9], %s412_s27  ;;  %p2703_p7 = scmp.eq.s32.totalorder (!%p2702_p4), %s2299_s6, 0 }
  0x86   : > { %2160 = dma.done.wait (%p2703_p7), %s413_s30, 1024   ;;  %p2704_p6 = pmov %p2703_p7 }
  0x88   : > { %2162 = vsyncadd (%p2704_p6), %s413_s30, 4294966272  ;;  %p2705_p9 = pmov %p2704_p6 }
  0x89   : > { %p2706_p3 = pmov %p2704_p6 }
  0x8a   : > { %2164 = dma.done.wait (%p2705_p9), [#allocation12], 1024  }
  0x8b   : > { %2166 = vsyncadd (%p2706_p3), [#allocation12], 4294966272  ;;  %s427_s28 = sand.u32 1, %s2185_s12   ;;  %p2707_p12 = scmp.ne.s32.totalorder %s2684_s17, 0 }
  0x8c   : > { %s1563_s18 = sshll.u32 %s427_s28, 6 }
  0x8d   : > { %s2481_s29 = scalar_lea.vmem [#allocation13], %s1563_s18 }
  0x8e   : > { %2168 = dma.done.wait (%p2707_p12), %s413_s30, 1024  }
  0x8f   : > { %2170 = vsyncadd (%p2707_p12), %s413_s30, 4294966272  ;;  %p2708_p11 = pmov %p2706_p3 }
  0x90   : > { %p2709_p8 = pmov %p2706_p3 }
  0x91   : > { %2172 = dma.done.wait (%p2708_p11), [#allocation12], 2048  }
  0x92   : > { %2174 = vsyncadd (%p2709_p8), [#allocation12], 4294965248  ;;  %p481_p13 = scmp.lt.s32.totalorder %s2193_s14, 1  ;;  %p493_p1 = scmp.eq.s32.totalorder %s2193_s14, 0 }
  0x93   : > { %v1963_v1 = vld [vmem:[#allocation8] sm:$0xff] (%p493_p1)   ;;  %v1964_v2 = vld [vmem:[#allocation8 + $0x8] sm:$0xff] (%p493_p1)   ;;  %v1965_v3 = vld [vmem:[#allocation8 + $0x10] sm:$0xff] (%p493_p1)  }
  0x94   : > { %s2494_s24 = scalar_select %p481_p13, %s2193_s14, 1 }
  0x95   : > { %498 = sbr.rel (!%p493_p1) target bundleno = 156 (0x9c), region = 76  ;;  %566 = vst [vmem:[#allocation2] sm:$0xff] (%p493_p1), %v1963_v1  ;;  %567 = vst [vmem:[#allocation2 + $0x8] sm:$0xff] (%p493_p1), %v1964_v2  ;;  %v1966_v4 = vld [vmem:[#allocation8 + $0x18] sm:$0xff] (%p493_p1)   ;;  %v1967_v5 = vld [vmem:[#allocation8 + $0x20] sm:$0xff] (%p493_p1)  }
  0x96   : > { %s483_s9 = scalar_lea.vmem %s2662_s3, %s2494_s24  ;;  %568 = vst [vmem:[#allocation2 + $0x10] sm:$0xff] (%p493_p1), %v1965_v3  ;;  %569 = vst [vmem:[#allocation2 + $0x18] sm:$0xff] (%p493_p1), %v1966_v4  ;;  %v1968_v6 = vld [vmem:[#allocation8 + $0x28] sm:$0xff] (%p493_p1)   ;;  %v1969_v7 = vld [vmem:[#allocation8 + $0x30] sm:$0xff] (%p493_p1)  }
  0x97   : > { %570 = vst [vmem:[#allocation2 + $0x20] sm:$0xff] (%p493_p1), %v1967_v5  ;;  %571 = vst [vmem:[#allocation2 + $0x28] sm:$0xff] (%p493_p1), %v1968_v6  ;;  %v1970_v8 = vld [vmem:[#allocation8 + $0x38] sm:$0xff] (%p493_p1)  }
  0x98   : > { %572 = vst [vmem:[#allocation2 + $0x30] sm:$0xff] (%p493_p1), %v1969_v7  ;;  %573 = vst [vmem:[#allocation2 + $0x38] sm:$0xff] (%p493_p1), %v1970_v8 }
  0x9c PF: > { %p594_p10 = scmp.lt.s32.totalorder %s2193_s14, 0  ;;  %s595_s17 = ssub.s32 0, %s2193_s14  ;;  %v1971_v9 = vld [vmem:[#allocation11] sm:$0xff]   ;;  %v1980_v11 = vld [vmem:[%s2481_s29 + $0x8] sm:$0xff]   ;;  %v1981_v14 = vld [vmem:[%s2481_s29 + $0x10] sm:$0xff]  }
  0x9d   : > { %s1574_s25 = smin.u32 %s2193_s14, %s595_s17  ;;  %1695 = vmatprep.mubr.bf16.mxu0 %v1971_v9  ;;  %v1979_v10 = vld [vmem:[%s2481_s29] sm:$0xff]   ;;  %v1982_v16 = vld [vmem:[%s2481_s29 + $0x18] sm:$0xff]   ;;  %v1984_v20 = vld [vmem:[%s2481_s29 + $0x28] sm:$0xff]   ;;  %s1038_s16 = sadd.s32 1, %s2193_s14 }
  0x9e   : > { %s597_s22 = sand.u32 1, %s1574_s25   ;;  %1711 = vmatprep.subr.bf16.mxu1 %v1979_v10  ;;  %v1983_v18 = vld [vmem:[%s2481_s29 + $0x20] sm:$0xff]   ;;  %v1985_v22 = vld [vmem:[%s2481_s29 + $0x30] sm:$0xff]   ;;  %v1972_v25 = vld [vmem:[#allocation11 + $0x8] sm:$0xff]   ;;  %s1040_s27 = ssub.s32 0, %s1038_s16 }
  0x9f   : > { %s598_s20 = ssub.s32 0, %s597_s22  ;;  %1712 = vmatpush3.bf16.msra.mxu1 %v1979_v10  ;;  %v1973_v26 = vld [vmem:[#allocation11 + $0x10] sm:$0xff]   ;;  %v1974_v27 = vld [vmem:[#allocation11 + $0x18] sm:$0xff]   ;;  %v1975_v28 = vld [vmem:[#allocation11 + $0x20] sm:$0xff]   ;;  %s1596_s30 = smin.u32 %s1040_s27, %s1038_s16 }
  0xa0   : > { %s2720_s20 = smov (!%p594_p10, %s598_s20), %s597_s22  ;;  %1713 = vmatprep.subr.bf16.mxu1 %v1980_v11  ;;  %v1976_v29 = vld [vmem:[#allocation11 + $0x28] sm:$0xff]   ;;  %v1977_v30 = vld [vmem:[#allocation11 + $0x30] sm:$0xff]   ;;  %v1978_v31 = vld [vmem:[#allocation11 + $0x38] sm:$0xff]   ;;  %s1042_s28 = sand.u32 1, %s1596_s30  }
  0xa1   : > { %p1576_p0 = scmp.lt.s32.totalorder %s2720_s20, 0  ;;  %s604_s26 = sadd.s32 2, %s2720_s20  ;;  %v1986_v32 = vld [vmem:[%s2481_s29 + $0x38] sm:$0xff]   ;;  %v1587_v57 = vld [vmem:[%s483_s9] ss:$0 sm:$0xff] }
  0xa2   : > { %p1039_p2 = scmp.lt.s32.totalorder %s1038_s16, 0  ;;  %s1043_s18 = ssub.s32 0, %s1042_s28 }
  0xa3   : > { %s2722_s26 = smov (!%p1576_p0, %s604_s26), %s2720_s20  ;;  %1714 = vmatpush3.bf16.msra.mxu1 %v1980_v11  ;;  %p1601_p4 = scmp.ne.s32.totalorder %s2193_s14, 1 }
  0xa4   : > { %s1611_s23 = sshll.u32 %s2722_s26, 6  ;;  %1715 = vmatprep.subr.bf16.mxu1 %v1981_v14  ;;  %s2724_s18 = smov (!%p1039_p2, %s1043_s18), %s1042_s28  ;;  %vm1078_vm1 = vcmask (!%p1601_p4), 7168   ;;  %vm2215_vm2 = vmmov (!%p1601_p4), 0  }
  0xa5   : > { %s2505_s11 = scalar_lea.vmem [#allocation2], %s1611_s23  ;;  %p1598_p5 = scmp.lt.s32.totalorder %s2724_s18, 0 }
  0xa6   : > { %v610_v12 = vld [vmem:[%s2505_s11] sm:$0xff]  ;;  %v611_v13 = vld [vmem:[%s2505_s11 + $0x8] sm:$0xff]  ;;  %v612_v15 = vld [vmem:[%s2505_s11 + $0x10] sm:$0xff]  ;;  %s1049_s29 = sadd.s32 2, %s2724_s18 }
  0xa7   : > { %1679 = vmatprep.subr.bf16.mxu0 %v610_v12  ;;  %v613_v17 = vld [vmem:[%s2505_s11 + $0x18] sm:$0xff]  ;;  %1716 = vmatpush3.bf16.msra.mxu1 %v1981_v14  ;;  %v614_v19 = vld [vmem:[%s2505_s11 + $0x20] sm:$0xff]  ;;  %v615_v21 = vld [vmem:[%s2505_s11 + $0x28] sm:$0xff]  ;;  %s2726_s29 = smov (!%p1598_p5, %s1049_s29), %s2724_s18 }
  0xa8   : > { %1680 = vmatpush3.bf16.msra.mxu0 %v610_v12  ;;  %1717 = vmatprep.subr.bf16.mxu1 %v1982_v16  ;;  %v616_v23 = vld [vmem:[%s2505_s11 + $0x30] sm:$0xff]  ;;  %v617_v24 = vld [vmem:[%s2505_s11 + $0x38] sm:$0xff]  ;;  %s1612_s17 = sshll.u32 %s2726_s29, 6 }
  0xa9   : > { %1681 = vmatprep.subr.bf16.mxu0 %v611_v13  ;;  %s2545_s24 = scalar_lea.vmem [#allocation2], %s1612_s17 }
  0xab   : > { %1718 = vmatpush3.bf16.msra.mxu1 %v1982_v16 }
  0xac   : > { %1682 = vmatpush3.bf16.msra.mxu0 %v611_v13  ;;  %1719 = vmatprep.subr.bf16.mxu1 %v1983_v18 }
  0xad   : > { %1683 = vmatprep.subr.bf16.mxu0 %v612_v15 }
  0xaf   : > { %1720 = vmatpush3.bf16.msra.mxu1 %v1983_v18 }
  0xb0   : > { %1684 = vmatpush3.bf16.msra.mxu0 %v612_v15  ;;  %1721 = vmatprep.subr.bf16.mxu1 %v1984_v20 }
  0xb1   : > { %1685 = vmatprep.subr.bf16.mxu0 %v613_v17 }
  0xb3   : > { %1722 = vmatpush3.bf16.msra.mxu1 %v1984_v20 }
  0xb4   : > { %1686 = vmatpush3.bf16.msra.mxu0 %v613_v17  ;;  %1723 = vmatprep.subr.bf16.mxu1 %v1985_v22 }
  0xb5   : > { %1687 = vmatprep.subr.bf16.mxu0 %v614_v19 }
  0xb7   : > { %1724 = vmatpush3.bf16.msra.mxu1 %v1985_v22 }
  0xb8   : > { %1688 = vmatpush3.bf16.msra.mxu0 %v614_v19  ;;  %1725 = vmatprep.subr.bf16.mxu1 %v1986_v32 }
  0xb9   : > { %1689 = vmatprep.subr.bf16.mxu0 %v615_v21 }
  0xbb   : > { %1726 = vmatpush3.bf16.msra.mxu1 %v1986_v32 }
  0xbc   : > { %1690 = vmatpush3.bf16.msra.mxu0 %v615_v21 }
  0xbd   : > { %1691 = vmatprep.subr.bf16.mxu0 %v616_v23 }
  0xc0   : > { %1692 = vmatpush3.bf16.msra.mxu0 %v616_v23 }
  0xc1   : > { %1693 = vmatprep.subr.bf16.mxu0 %v617_v24 }
  0xc4   : > { %1694 = vmatpush3.bf16.msra.mxu0 %v617_v24 }
  0xc7   : > { %1696 = vmatmul.mubr.bf16.vlgmr.msra.gmra.mrb[0].mxu0 %v1972_v25 }
  0xc8   : > { %1699 = vmatprep.mubr.bf16.mxu0 %v1973_v26 }
  0xcf   : > { %1700 = vmatmul.mubr.bf16.gmra.mrb[4].mxu0 %v1974_v27 }
  0xd0   : > { %1703 = vmatprep.mubr.bf16.mxu0 %v1975_v28 }
  0xd7   : > { %1704 = vmatmul.mubr.bf16.gmra.mrb[8].mxu0 %v1976_v29 }
  0xd8   : > { %1707 = vmatprep.mubr.bf16.mxu0 %v1977_v30 }
  0xdf   : > { %1708 = vmatmul.mubr.bf16.gmra.mrb[12].mxu0 %v1978_v31 }
 0x19a   : > { %v1697_v33 = vpop.f32.mrb[0].mxu0 }
 0x19b   : > { %v732_v34 = vpop.f32.mrb[1].mxu0 }
 0x19c   : > { %v1698_v35 = vpop.f32.mrb[2].mxu0 }
 0x19d   : > { %v847_v36 = vpack.c.bf16 %v1698_v35, %v1697_v33  ;;  %v735_v37 = vpop.f32.mrb[3].mxu0 }
 0x19e   : > { %v846_v38 = vpack.c.bf16 %v735_v37, %v732_v34 }
 0x1a0   : > { %1727 = vmatprep.mubr.bf16.mxu1 %v846_v38 }
 0x1a1   : > { %1728 = vmatmul.mubr.bf16.vlgmr.msra.gmra.mrb[0].mxu1 %v847_v36 }
 0x1a2   : > { %v1701_v39 = vpop.f32.mrb[4].mxu0 }
 0x1a3   : > { %v748_v40 = vpop.f32.mrb[5].mxu0 }
 0x1a4   : > { %v1702_v41 = vpop.f32.mrb[6].mxu0 }
 0x1a5   : > { %v849_v42 = vpack.c.bf16 %v1702_v41, %v1701_v39  ;;  %v751_v43 = vpop.f32.mrb[7].mxu0 }
 0x1a6   : > { %v848_v44 = vpack.c.bf16 %v751_v43, %v748_v40 }
 0x1a8   : > { %1731 = vmatprep.mubr.bf16.mxu1 %v848_v44 }
 0x1a9   : > { %1732 = vmatmul.mubr.bf16.gmra.mrb[4].mxu1 %v849_v42 }
 0x1aa   : > { %v1705_v45 = vpop.f32.mrb[8].mxu0 }
 0x1ab   : > { %v764_v46 = vpop.f32.mrb[9].mxu0 }
 0x1ac   : > { %v1706_v47 = vpop.f32.mrb[10].mxu0 }
 0x1ad   : > { %v851_v48 = vpack.c.bf16 %v1706_v47, %v1705_v45  ;;  %v767_v49 = vpop.f32.mrb[11].mxu0 }
 0x1ae   : > { %v850_v50 = vpack.c.bf16 %v767_v49, %v764_v46 }
 0x1b0   : > { %1735 = vmatprep.mubr.bf16.mxu1 %v850_v50  ;;  %v1602_v50 = vld [vmem:[%s2664_s5] ss:$0 sm:$0xff] (!%p1601_p4) }
 0x1b1   : > { %1736 = vmatmul.mubr.bf16.gmra.mrb[8].mxu1 %v851_v48 }
 0x1b2   : > { %v1709_v51 = vpop.f32.mrb[12].mxu0 }
 0x1b3   : > { %v780_v52 = vpop.f32.mrb[13].mxu0 }
 0x1b4   : > { %v1710_v53 = vpop.f32.mrb[14].mxu0 }
 0x1b5   : > { %v853_v54 = vpack.c.bf16 %v1710_v53, %v1709_v51  ;;  %v783_v55 = vpop.f32.mrb[15].mxu0 }
 0x1b6   : > { %v852_v56 = vpack.c.bf16 %v783_v55, %v780_v52 }
 0x1b8   : > { %1739 = vmatprep.mubr.bf16.mxu1 %v852_v56 }
 0x1b9   : > { %1740 = vmatmul.mubr.bf16.gmra.mrb[12].mxu1 %v853_v54 }
 0x274   : > { %v1729_v58 = vpop.f32.mrb[0].mxu1 }
 0x275   : > { %v2527_v59 = vadd.f32 %v1729_v58, %v1587_v57  ;;  %v959_v60 = vpop.f32.mrb[1].mxu1 }
 0x276   : > { %v2529_v61 = vadd.f32 %v1587_v57, %v959_v60  ;;  %v1730_v62 = vpop.f32.mrb[2].mxu1 }
 0x277   : > { %v2531_v63 = vadd.f32 %v1730_v62, %v1587_v57  ;;  %v962_v0 = vpop.f32.mrb[3].mxu1  ;;  %v1024_v2 = vmax.f32 %v2527_v59, 0.0 }
 0x278   : > { %v2533_v1 = vadd.f32 %v1587_v57, %v962_v0  ;;  %v1022_v4 = vmax.f32 %v2529_v61, 0.0 }
 0x279   : > { %v1025_v3 = vmax.f32 %v2531_v63, 0.0  ;;  %v1092_v52 = vmul.f32 (!%p1601_p4), %v1602_v50, %v1024_v2 }
 0x27a   : > { %v1023_v5 = vmax.f32 %v2533_v1, 0.0  ;;  %v1090_v51 = vmul.f32 (!%p1601_p4), %v1602_v50, %v1022_v4 }
 0x27b   : > { %v2541_v6 = vpack.c.bf16 %v1025_v3, %v1024_v2  ;;  %1110 = vadd.xlane.f32.xlu1 (!%p1601_p4), %v1092_v52  ;;  %v1093_v54 = vmul.f32 (!%p1601_p4), %v1602_v50, %v1025_v3  ;;  %v1603_v3 = vld [vmem:[#allocation7] ss:$0 sm:$0xff] (!%p1601_p4)  ;;  %v2212_v52 = vmov (!%p1601_p4), 0  }
 0x27c   : > { %v2543_v7 = vpack.c.bf16 %v1023_v5, %v1022_v4  ;;  %v1733_v8 = vpop.f32.mrb[4].mxu1  ;;  %1106 = vadd.xlane.f32.xlu0 (!%p1601_p4), %v1090_v51  ;;  %v1091_v53 = vmul.f32 (!%p1601_p4), %v1602_v50, %v1023_v5  ;;  %v2211_v51 = vmov (!%p1601_p4), -1e+30   ;;  %1987 = vset.pattern.permute.xlu1 (!%p1601_p4), %v2212_v52 }
 0x27d   : > { %1064 = vst [vmem:[%s2545_s24 + $0x8] sm:$0xff] %v2541_v6  ;;  %v2549_v9 = vadd.f32 %v1733_v8, %v1587_v57  ;;  %v975_v10 = vpop.f32.mrb[5].mxu1  ;;  %1079 = vst.msk [vmem:[#allocation4] sm:$0xff] (!%p1601_p4), %vm1078_vm1, %v2211_v51 }
 0x27e   : > { %1063 = vst [vmem:[%s2545_s24] sm:$0xff] %v2543_v7  ;;  %v976_v11 = vadd.f32 %v1587_v57, %v975_v10  ;;  %v1734_v12 = vpop.f32.mrb[6].mxu1 }
 0x27f   : > { %v987_v13 = vadd.f32 %v1734_v12, %v1587_v57  ;;  %v978_v14 = vpop.f32.mrb[7].mxu1  ;;  %v1028_v16 = vmax.f32 %v2549_v9, 0.0  ;;  %1112 = vadd.xlane.f32.xlu1 (!%p1601_p4), %v1093_v54  ;;  %v2214_v54 = vmov (!%p1601_p4), 0.0  }
 0x280   : > { %v979_v15 = vadd.f32 %v1587_v57, %v978_v14  ;;  %v1026_v18 = vmax.f32 %v976_v11, 0.0  ;;  %1108 = vadd.xlane.f32.xlu0 (!%p1601_p4), %v1091_v53  ;;  %v2213_v53 = vmov (!%p1601_p4), 0.0|0.0   ;;  %1080 = vst.msk [vmem:[#allocation5] sm:$0xff] (!%p1601_p4), %vm1078_vm1, %v2214_v54  ;;  %1775 = vmatprep.mubr.msk.f32.mxu0 (!%p1601_p4), %vm2215_vm2, %v2214_v54 }
 0x281   : > { %v1029_v17 = vmax.f32 %v987_v13, 0.0  ;;  %1813 = vmatprep.subr.bf16.mxu0 (!%p1601_p4), %v2213_v53  ;;  %1837 = vmatprep.subr.bf16.mxu1 (!%p1601_p4), %v2213_v53 }
 0x282   : > { %v1027_v19 = vmax.f32 %v979_v15, 0.0  ;;  %v1094_v55 = vmul.f32 (!%p1601_p4), %v1602_v50, %v1026_v18  ;;  %1815 = vmatpush3.bf16.msra.mxu0 (!%p1601_p4), %v2543_v7  ;;  %1810 = vmatprep.mubr.msk.f32.mxu1 (!%p1601_p4), %vm2215_vm2, %v2214_v54 }
 0x283   : > { %v2554_v20 = vpack.c.bf16 %v1029_v17, %v1028_v16  ;;  %v1097_v58 = vmul.f32 (!%p1601_p4), %v1602_v50, %v1029_v17  ;;  %1816 = vmatprep.subr.bf16.mxu0 (!%p1601_p4), %v2213_v53 }
 0x284   : > { %v2556_v21 = vpack.c.bf16 %v1027_v19, %v1026_v18  ;;  %v1737_v22 = vpop.f32.mrb[8].mxu1  ;;  %v1095_v56 = vmul.f32 (!%p1601_p4), %v1602_v50, %v1027_v19  ;;  %1114 = vadd.xlane.f32.xlu0 (!%p1601_p4), %v1094_v55 }
 0x285   : > { %1066 = vst [vmem:[%s2545_s24 + $0x18] sm:$0xff] %v2554_v20  ;;  %v1000_v23 = vadd.f32 %v1737_v22, %v1587_v57  ;;  %v991_v24 = vpop.f32.mrb[9].mxu1 }
 0x286   : > { %1065 = vst [vmem:[%s2545_s24 + $0x10] sm:$0xff] %v2556_v21  ;;  %v992_v25 = vadd.f32 %v1587_v57, %v991_v24  ;;  %v1738_v26 = vpop.f32.mrb[10].mxu1  ;;  %1116 = vadd.xlane.f32.xlu1 (!%p1601_p4), %v1095_v56  ;;  %1818 = vmatpush3.bf16.msra.mxu0 (!%p1601_p4), %v2541_v6  ;;  %v1199_v6 = vld [vmem:[#allocation4] sm:$0xff] (!%p1601_p4) }
 0x287   : > { %v1003_v27 = vadd.f32 %v1738_v26, %v1587_v57  ;;  %v994_v28 = vpop.f32.mrb[11].mxu1  ;;  %v1032_v30 = vmax.f32 %v1000_v23, 0.0  ;;  %1819 = vmatprep.subr.bf16.mxu0 (!%p1601_p4), %v2213_v53 }
 0x288   : > { %v995_v29 = vadd.f32 %v1587_v57, %v994_v28  ;;  %v1030_v32 = vmax.f32 %v992_v25, 0.0 }
 0x289   : > { %v1033_v31 = vmax.f32 %v1003_v27, 0.0  ;;  %v1100_v61 = vmul.f32 (!%p1601_p4), %v1602_v50, %v1032_v30 }
 0x28a   : > { %v1031_v33 = vmax.f32 %v995_v29, 0.0  ;;  %1120 = vadd.xlane.f32.xlu1 (!%p1601_p4), %v1097_v58  ;;  %v1098_v59 = vmul.f32 (!%p1601_p4), %v1602_v50, %v1030_v32  ;;  %1821 = vmatpush3.bf16.msra.mxu0 (!%p1601_p4), %v2556_v21  ;;  %v1317_v58 = vld [vmem:[#allocation14 + $0x10] sm:$0xff] (!%p1601_p4) }
 0x28b   : > { %v2562_v34 = vpack.c.bf16 %v1033_v31, %v1032_v30  ;;  %v1101_v62 = vmul.f32 (!%p1601_p4), %v1602_v50, %v1033_v31  ;;  %1822 = vmatprep.subr.bf16.mxu0 (!%p1601_p4), %v2213_v53 }
 0x28c   : > { %v2564_v35 = vpack.c.bf16 %v1031_v33, %v1030_v32  ;;  %v1741_v36 = vpop.f32.mrb[12].mxu1  ;;  %v1099_v60 = vmul.f32 (!%p1601_p4), %v1602_v50, %v1031_v33 }
 0x28d   : > { %1068 = vst [vmem:[%s2545_s24 + $0x28] sm:$0xff] %v2562_v34  ;;  %v1016_v37 = vadd.f32 %v1741_v36, %v1587_v57  ;;  %v1007_v38 = vpop.f32.mrb[13].mxu1 }
 0x28e   : > { %1067 = vst [vmem:[%s2545_s24 + $0x20] sm:$0xff] %v2564_v35  ;;  %v1008_v39 = vadd.f32 %v1587_v57, %v1007_v38  ;;  %v1742_v40 = vpop.f32.mrb[14].mxu1  ;;  %1124 = vadd.xlane.f32.xlu1 (!%p1601_p4), %v1099_v60  ;;  %1824 = vmatpush3.bf16.msra.mxu0 (!%p1601_p4), %v2554_v20  ;;  %v1318_v60 = vld [vmem:[#allocation14 + $0x18] sm:$0xff] (!%p1601_p4) }
 0x28f   : > { %v1019_v41 = vadd.f32 %v1742_v40, %v1587_v57  ;;  %v1010_v42 = vpop.f32.mrb[15].mxu1  ;;  %v1036_v44 = vmax.f32 %v1016_v37, 0.0  ;;  %1825 = vmatprep.subr.bf16.mxu0 (!%p1601_p4), %v2213_v53 }
 0x290   : > { %v1011_v43 = vadd.f32 %v1587_v57, %v1010_v42  ;;  %v1034_v46 = vmax.f32 %v1008_v39, 0.0  ;;  %1074 = sbr.rel (%p1601_p4) target bundleno = 1711 (0x6af), region = 88  ;;  %v1096_v57 = vmul.f32 (!%p1601_p4), %v1602_v50, %v1028_v16  ;;  %v1194_v42 = vlaneseq (!%p1601_p4) }
 0x291   : > { %v1037_v45 = vmax.f32 %v1019_v41, 0.0  ;;  %v1104_v1 = vmul.f32 (!%p1601_p4), %v1602_v50, %v1036_v44 }
 0x292   : > { %v1035_v47 = vmax.f32 %v1011_v43, 0.0  ;;  %1118 = vadd.xlane.f32.xlu0 (!%p1601_p4), %v1096_v57  ;;  %1128 = vadd.xlane.f32.xlu1 (!%p1601_p4), %v1101_v62  ;;  %v1102_v63 = vmul.f32 (!%p1601_p4), %v1602_v50, %v1034_v46  ;;  %v1195_v43 = vshrl.u32 (!%p1601_p4), %v1194_v42, 7  ;;  %v1315_v57 = vld [vmem:[#allocation14] sm:$0xff] (!%p1601_p4) }
 0x293   : > { %v2570_v48 = vpack.c.bf16 %v1037_v45, %v1036_v44  ;;  %v1105_v2 = vmul.f32 (!%p1601_p4), %v1602_v50, %v1037_v45  ;;  %v1082_v45 = vld [vmem:[%s2663_s4] sm:$0xff] (!%p1601_p4)  ;;  %1827 = vmatpush3.bf16.msra.mxu0 (!%p1601_p4), %v2564_v35  ;;  %v1319_v62 = vld [vmem:[#allocation14 + $0x20] sm:$0xff] (!%p1601_p4) }
 0x294   : > { %v2572_v49 = vpack.c.bf16 %v1035_v47, %v1034_v46  ;;  %v1103_v0 = vmul.f32 (!%p1601_p4), %v1602_v50, %v1035_v47  ;;  %v1196_v44 = vsub.s32 (!%p1601_p4), 0, %v1195_v43  ;;  %vm1161_vm0 = vcmp.gt.f32.partialorder (!%p1601_p4), %v1082_v45, 0.0  ;;  %1828 = vmatprep.subr.bf16.mxu0 (!%p1601_p4), %v2213_v53 }
 0x295   : > { %1070 = vst [vmem:[%s2545_s24 + $0x38] sm:$0xff] %v2570_v48 }
 0x296   : > { %1069 = vst [vmem:[%s2545_s24 + $0x30] sm:$0xff] %v2572_v49  ;;  %1122 = vadd.xlane.f32.xlu0 (!%p1601_p4), %v1098_v59  ;;  %1132 = vadd.xlane.f32.xlu1 (!%p1601_p4), %v1103_v0 }
 0x297   : > { %1830 = vmatpush3.bf16.msra.mxu0 %v2562_v34 }
 0x298   : > { %1831 = vmatprep.subr.bf16.mxu0 %v2213_v53 }
 0x29a   : > { %1126 = vadd.xlane.f32.xlu0 %v1100_v61  ;;  %1136 = vadd.xlane.f32.xlu1 %v1105_v2  ;;  %v1841_v61 = vpack.c.bf16 %v1318_v60, %v1317_v58  ;;  %v1322_v2 = vld [vmem:[#allocation14 + $0x38] sm:$0xff] }
 0x29b   : > { %1833 = vmatpush3.bf16.msra.mxu0 %v2572_v49 }
 0x29c   : > { %1834 = vmatprep.subr.bf16.mxu0 %v2213_v53 }
 0x29e   : > { %1130 = vadd.xlane.f32.xlu0 %v1102_v63  ;;  %v1320_v63 = vld [vmem:[#allocation14 + $0x28] sm:$0xff] }
 0x29f   : > { %1836 = vmatpush3.bf16.msra.mxu0 %v2570_v48  ;;  %v1316_v48 = vld [vmem:[#allocation14 + $0x8] sm:$0xff]  ;;  %v1844_v0 = vpack.c.bf16 %v1320_v63, %v1319_v62 }
 0x2a0   : > { %v1838_v59 = vpack.c.bf16 %v1316_v48, %v1315_v57 }
 0x2a2   : > { %1134 = vadd.xlane.f32.xlu0 %v1104_v1  ;;  %1839 = vmatpush3.bf16.msra.mxu1 %v1838_v59  ;;  %v1321_v1 = vld [vmem:[#allocation14 + $0x30] sm:$0xff] }
 0x2a3   : > { %1840 = vmatprep.subr.bf16.mxu1 %v2213_v53 }
 0x2a6   : > { %1842 = vmatpush3.bf16.msra.mxu1 %v1841_v61 }
 0x2a7   : > { %1843 = vmatprep.subr.bf16.mxu1 %v2213_v53 }
 0x2aa   : > { %1845 = vmatpush3.bf16.msra.mxu1 %v1844_v0 }
 0x2ab   : > { %1846 = vmatprep.subr.bf16.mxu1 %v2213_v53 }
 0x308   : > { %v1111_v8 = vpop.xlane.xlu1 %1110 }
 0x309   : > { %v1107_v4 = vpop.xlane.xlu0 %1106  ;;  %v1147_v11 = vadd.f32 %v1603_v3, %v1111_v8 }
 0x30a   : > { %v1145_v5 = vadd.f32 %v1603_v3, %v1107_v4  ;;  %v1323_v4 = vld [vmem:[#allocation14 + $0x40] sm:$0xff] }
 0x30c   : > { %1162 = vxpose.xlu0.b32.start [1/16] (narrow) %v1145_v5, 8  ;;  %v1113_v12 = vpop.xlane.xlu1 %1112  ;;  %v1324_v5 = vld [vmem:[#allocation14 + $0x48] sm:$0xff] }
 0x30d   : > { %v1109_v9 = vpop.xlane.xlu0 %1108  ;;  %v1148_v13 = vadd.f32 %v1603_v3, %v1113_v12  ;;  %v1850_v8 = vpack.c.bf16 %v1324_v5, %v1323_v4 }
 0x30e   : > { %v1146_v10 = vadd.f32 %v1603_v3, %v1109_v9 }
 0x310   : > { %1163 = vxpose.xlu0.b32.cont [2/16] (narrow) %v1146_v10, 8 }
 0x311   : > { %v1115_v14 = vpop.xlane.xlu0 %1114 }
 0x312   : > { %v1149_v15 = vadd.f32 %v1603_v3, %v1115_v14 }
 0x313   : > { %v1117_v16 = vpop.xlane.xlu1 %1116 }
 0x314   : > { %1164 = vxpose.xlu0.b32.cont [3/16] (narrow) %v1147_v11, 8  ;;  %v1150_v17 = vadd.f32 %v1603_v3, %v1117_v16  ;;  %v1215_v11 = vld [vmem:[#allocation5] sm:$0xff] }
 0x317   : > { %v1121_v22 = vpop.xlane.xlu1 %1120 }
 0x318   : > { %1165 = vxpose.xlu0.b32.cont [4/16] (narrow) %v1148_v13, 8  ;;  %v1152_v23 = vadd.f32 %v1603_v3, %v1121_v22  ;;  %v1327_v22 = vld [vmem:[#allocation14 + $0x60] sm:$0xff] }
 0x31b   : > { %v1125_v26 = vpop.xlane.xlu1 %1124 }
 0x31c   : > { %1166 = vxpose.xlu0.b32.cont [5/16] (narrow) %v1149_v15, 8  ;;  %v1154_v27 = vadd.f32 %v1603_v3, %v1125_v26  ;;  %v1330_v26 = vld [vmem:[#allocation14 + $0x78] sm:$0xff] }
 0x31f   : > { %v1119_v18 = vpop.xlane.xlu0 %1118  ;;  %v1129_v30 = vpop.xlane.xlu1 %1128 }
 0x320   : > { %1167 = vxpose.xlu0.b32.cont [6/16] (narrow) %v1150_v17, 8  ;;  %v1151_v19 = vadd.f32 %v1603_v3, %v1119_v18  ;;  %v1156_v31 = vadd.f32 %v1603_v3, %v1129_v30  ;;  %v1325_v17 = vld [vmem:[#allocation14 + $0x50] sm:$0xff]  ;;  %v1326_v18 = vld [vmem:[#allocation14 + $0x58] sm:$0xff] }
 0x323   : > { %v1123_v24 = vpop.xlane.xlu0 %1122  ;;  %v1133_v36 = vpop.xlane.xlu1 %1132 }
 0x324   : > { %1168 = vxpose.xlu0.b32.cont [7/16] (narrow) %v1151_v19, 8  ;;  %v1153_v25 = vadd.f32 %v1603_v3, %v1123_v24  ;;  %v1158_v37 = vadd.f32 %v1603_v3, %v1133_v36  ;;  %v1853_v19 = vpack.c.bf16 %v1326_v18, %v1325_v17 }
 0x327   : > { %v1127_v28 = vpop.xlane.xlu0 %1126  ;;  %v1137_v40 = vpop.xlane.xlu1 %1136 }
 0x328   : > { %1169 = vxpose.xlu0.b32.cont [8/16] (narrow) %v1152_v23, 8  ;;  %v1155_v29 = vadd.f32 %v1603_v3, %v1127_v28  ;;  %v1160_v41 = vadd.f32 %v1603_v3, %v1137_v40  ;;  %v1328_v23 = vld [vmem:[#allocation14 + $0x68] sm:$0xff] }
 0x329   : > { %v1856_v24 = vpack.c.bf16 %v1328_v23, %v1327_v22 }
 0x32b   : > { %v1131_v32 = vpop.xlane.xlu0 %1130 }
 0x32c   : > { %1170 = vxpose.xlu0.b32.cont [9/16] (narrow) %v1153_v25, 8  ;;  %v1157_v33 = vadd.f32 %v1603_v3, %v1131_v32  ;;  %v1329_v25 = vld [vmem:[#allocation14 + $0x70] sm:$0xff] }
 0x32f   : > { %v1135_v38 = vpop.xlane.xlu0 %1134 }
 0x330   : > { %1171 = vxpose.xlu0.b32.cont [10/16] (narrow) %v1154_v27, 8  ;;  %v1159_v39 = vadd.f32 %v1603_v3, %v1135_v38  ;;  %v1847_v3 = vpack.c.bf16 %v1322_v2, %v1321_v1  ;;  %v1859_v27 = vpack.c.bf16 %v1330_v26, %v1329_v25  ;;  %v1604_v38 = vld [vmem:[%s2667_s8] ss:$0 sm:$0xff] }
 0x332   : > { %1848 = vmatpush3.bf16.msra.mxu1 %v1847_v3 }
 0x333   : > { %1849 = vmatprep.subr.bf16.mxu1 %v2213_v53 }
 0x334   : > { %1172 = vxpose.xlu0.b32.cont [11/16] (narrow) %v1155_v29, 8 }
 0x336   : > { %1851 = vmatpush3.bf16.msra.mxu1 %v1850_v8 }
 0x337   : > { %1852 = vmatprep.subr.bf16.mxu1 %v2213_v53 }
 0x338   : > { %1173 = vxpose.xlu0.b32.cont [12/16] (narrow) %v1156_v31, 8 }
 0x33a   : > { %1854 = vmatpush3.bf16.msra.mxu1 %v1853_v19 }
 0x33b   : > { %1855 = vmatprep.subr.bf16.mxu1 %v2213_v53 }
 0x33c   : > { %1174 = vxpose.xlu0.b32.cont [13/16] (narrow) %v1157_v33, 8 }
 0x33e   : > { %1857 = vmatpush3.bf16.msra.mxu1 %v1856_v24 }
 0x33f   : > { %1858 = vmatprep.subr.bf16.mxu1 %v2213_v53 }
 0x340   : > { %1175 = vxpose.xlu0.b32.cont [14/16] (narrow) %v1158_v37, 8 }
 0x342   : > { %1860 = vmatpush3.bf16.msra.mxu1 %v1859_v27 }
 0x344   : > { %1176 = vxpose.xlu0.b32.cont [15/16] (narrow) %v1159_v39, 8 }
 0x348   : > { %1177 = vxpose.xlu0.b32.end [16/16] (narrow) %v1160_v41, 8 }
 0x371   : > { %1988 = vset.pattern.permute.xlu0 %v2212_v52 }
 0x38c   : > { %v1178_v46 = vpop.trf.xlu0 }
 0x38d   : > { %v1197_v47 = vrot.slane %v1178_v46, %v1196_v44 }
 0x38f   : > { %v1198_v50 = vsel %vm1161_vm0, %v1197_v47, -1e+30 }
 0x390   : > { %1200 = vmax.xlane.f32.xlu1 %v1198_v50 }
 0x41d   : > { %v1201_v7 = vpop.xlane.xlu1 %1200 }
 0x41e   : > { %v1202_v21 = vmax.f32 %v1199_v6, %v1201_v7 }
 0x420   : > { %v1203_v20 = vsub.f32 %v1199_v6, %v1202_v21  ;;  %1301 = vst.msk [vmem:[#allocation4] sm:$0xff] %vm1078_vm1, %v1202_v21  ;;  %1208 = vperm.xlu1 %1987, %v1202_v21  }
 0x422   : > { %v1204_v9 = vmul.f32 1.442695, %v1203_v20 }
 0x49f   : > { %v1209_v35 = vpop.permute.xlu1 %1208 }
 0x4a0   : > { %v1211_v34 = vsub.f32 %v1198_v50, %v1209_v35 }
 0x4a2   : > { %v1212_v55 = vmul.f32 1.442695, %v1211_v34 }
 0x4a4   : > { %1989 = vpow2.f32 %v1212_v55 }
 0x4a5   : > { %1991 = vpow2.f32 %v1204_v9 }
 0x4ae   : > { %v1990_v56 = vpop.eup %1989 }
 0x4af   : > { %v1214_v49 = vmul.f32 %v1990_v56, %v1082_v45  ;;  %v1992_v10 = vpop.eup %1991 }
 0x4b0   : > { %v1216_v12 = vmul.f32 %v1992_v10, %v1215_v11 }
 0x4b1   : > { %1217 = vadd.xlane.f32.xlu1 %v1214_v49  ;;  %1776 = vmatmul.mubr.f32.vlgmr.msra.gmra.mrb[0].mxu0 %v1214_v49 }
 0x53e   : > { %v1218_v13 = vpop.xlane.xlu1 %1217 }
 0x53f   : > { %v1219_v14 = vadd.f32 %v1218_v13, %v1216_v12 }
 0x541   : > { %1221 = vst.msk [vmem:[#allocation5] sm:$0xff] %vm1078_vm1, %v1219_v14 }
 0x548   : > { %v1305_v15 = vld [vmem:[#allocation5] sm:$0xff] }
 0x549   : > { %v1306_v16 = vmax.f32 %v1305_v15, 1e-20 }
 0x54b   : > { %1310 = vperm.xlu1 %1987, %v1306_v16  }
 0x54f   : > { %1225 = vperm.xlu1 %1987, %v1992_v10  }
 0x584   : > { %v1295_v28 = vpop.f32.mrb[0].mxu0 }
 0x585   : > { %v1777_v29 = vpop.f32.mrb[1].mxu0 }
 0x5ca   : > { %v1311_v30 = vpop.permute.xlu1 %1310 }
 0x5cb   : > { %1993 = vrcp.f32 %v1311_v30 }
 0x5ce   : > { %v1226_v31 = vpop.permute.xlu1 %1225 }
 0x5cf   : > { %v1228_v32 = vmul.f32 0.0, %v1226_v31 }
 0x5d1   : > { %v1299_v33 = vadd.f32 %v1295_v28, %v1228_v32 }
 0x5d5   : > { %v1994_v36 = vpop.eup %1993 }
 0x5d6   : > { %v1314_v37 = vmul.f32 %v1994_v36, %v1299_v33 }
 0x5d8   : > { %1811 = vmatmul.mubr.f32.vlgmr.msra.gmra.mrb[0].mxu1 %v1314_v37 }
 0x6ab   : > { %v1404_v39 = vpop.f32.mrb[0].mxu1 }
 0x6ac   : > { %v1405_v40 = vadd.f32 %v1604_v38, %v1404_v39  ;;  %v1812_v41 = vpop.f32.mrb[1].mxu1 }
 0x6ae   : > { %1408 = vst [vmem:[#allocation15] sm:$0xff] %v1405_v40 }
 0x6af PF: > { %p1900_p7 = scmp.eq.s32.totalorder %s2299_s6, 1  ;;  %s2216_s23 = smov [#allocation15]  }
 0x6b0   : > { %s1416_s11 = sshll.u32 %s2216_s23, 4  ;;  %s1417_s11 = int_to_ptr.vmem [resolvable:$true] %s1416_s11 }
 0x6b1   : > { %s2109_s16 = scalar_lea.vmem %s1417_s11, 128  ;;  %p2116_p12 = scmp.lt.s32.totalorder %s1417_s11, %s1417_s11 }
 0x6b2   : > { %p2110_p6 = scmp.ne.s32.totalorder %s1417_s11, %s2109_s16  ;;  %p2117_p11 = scmp.lt.s32.totalorder %s2109_s16, %s2109_s16 }
 0x6b4   : > { %p2111_p9 = pnand %p2110_p6, %p1900_p7  ;;  %p2118_p8 = por %p2117_p11, %p2116_p12 }
 0x6b6   : > { %p2112_p3 = pneg %p2111_p9 }
 0x6b8   : > { %p2119_p13 = pnand %p2118_p8, %p2112_p3 }
 0x6ba   : > { %2122 = shalt.err (!%p2119_p13)
}
 0x6bb   : > { %s2710_s28 = sld [smem:[#allocation23_spill]] }
 0x6c1   : > { %s2123_s18 = scalar_lea.hbm %s2710_s28, 128 }
 0x6c2   : > { %p2124_p1 = scmp.ne.s32.totalorder %s2710_s28, %s2123_s18  ;;  %p2129_p2 = scmp.lt.u32.totalorder %s2123_s18, %s2710_s28 }
 0x6c4   : > { %p2125_p10 = pnand %p2124_p1, %p1900_p7 }
 0x6c6   : > { %p2126_p0 = pneg %p2125_p10 }
 0x6c8   : > { %p2131_p5 = pnand %p2129_p2, %p2126_p0 }
 0x6ca   : > { %2134 = shalt.err (!%p2131_p5)
}
 0x6cb   : > { %1876 = dma.vmem_to_hbm [thread:$0]  (%p1900_p7), %s1417_s11, 128, %s2710_s28, [#allocation10]  }
 0x6cc   : > { %2176 = dma.done.wait (%p1900_p7), [#allocation10], 128  }
 0x6cd   : > { %2178 = vsyncadd (%p1900_p7), [#allocation10], 4294967168 }
 0x6ce PF: > { %s2711_s25 = sld [smem:[#allocation21_spill]]  ;;  %s2712_s11 = smov %s2185_s12 }
 0x6cf   : > { %s2713_s12 = smov %s2189_s13  ;;  %s2714_s13 = smov %s2467_s10 }
 0x6d0   : > { %s2715_s14 = smov %s2197_s15  ;;  %s2716_s15 = smov %s2718_s19 }
 0x6d4   : > { %s26_s16 = sadd.s32 1, %s2711_s25  }
 0x6d5   : > { %p23_p4 = scmp.ge.s32.totalorder %s26_s16, 4  }
 0x6d7   :  { %25 = sbr.rel (!%p23_p4) target bundleno = 9 (0x9), region = 146 }
 0x6de   :  { %1429 = vsyncpa [#allocation9], 1 }
 0x6df   :  { %1431 = vsyncpa [#allocation9 + $0x1], 1 }
 0x6e0   :  { %1432 = vsyncpa [#allocation12], 1 }
 0x6e1   :  { %1433 = vsyncpa [#allocation10], 1 }
 0x6e2   :  { %1435 = vsyncpa [#allocation10 + $0x1], 1 }

</bundles_post_ra>
